<compile_context>
chip_gen: v5e
topology: v5e:2x2
jax: 0.10.0
libtpu: 0.0.40
codegen_flags: <defaults>
</compile_context>

<pallas_src>
import functools

import jax
import jax.numpy as jnp
from jax.experimental import pallas as pl
from jax.experimental.pallas import tpu as pltpu


def _softplus(x):
    # matches torch.nn.Softplus(beta=1, threshold=20)
    return jnp.where(x > 20.0, x, jnp.log(1.0 + jnp.exp(jnp.minimum(x, 20.0))))


def _silu(x):
    return x * (1.0 / (1.0 + jnp.exp(-x)))


# ----------------------------- Pallas kernel -----------------------------
def vim_block_kernel(x_ref, wp_ref, wfb_ref, wd_ref, wbc_ref, v_ref, o_ref,
                     h_ref, da_ref, bx_ref, cb_ref, y_ref, *, B, D, N, TS):
    """One time-chunk per grid step.

    x_ref   : (TS, E)       activations, time-major, duplicated over direction
    wp_ref  : (B*D, E)      proj weight (per-batch block diag, tiled over dir)   bf16
    wfb_ref : (B*D, E)      fwd|bwd conv1d(k=1) weight                           bf16
    wd_ref  : (E, E)        fused delta projection (dt_proj folded in)           bf16
    wbc_ref : (E, 2*G*N)    B|C projections                                      bf16
    v_ref   : (8+N, E)      f32 vectors: LN gamma/beta, biases, D, A
    o_ref   : (TS, E)
    scratch : h (N,E) carried state; da/bx/cb (TS,N,E) staging; y (TS,E) scan out
    """
    ED = D
    BD = B * D
    G = 2 * B
    E = G * ED
    GN = G * N

    xin = x_ref[...].astype(jnp.float32)                    # (TS, E) (skip, dup)

    # ---- packed vectors (f32) ----
    gamma = v_ref[0:1, 0:BD]
    beta = v_ref[1:2, 0:BD]
    bp = v_ref[2:3, :]                                       # (1, E)
    bfb = v_ref[3:4, :]
    bdt = v_ref[4:5, :]
    Dlane = v_ref[5:6, :]
    A_l = v_ref[8:8 + N, :]                                  # (N, E), A = -exp(A_log)

    def mm(a, w):                                            # bf16 MXU, f32 accumulate
        return jnp.dot(a.astype(jnp.bfloat16), w, preferred_element_type=jnp.float32)

    # ---- LayerNorm (per batch, on the dir=0 half; both halves are copies) ----
    pieces = []
    for b in range(B):
        xb = xin[:, b * D:(b + 1) * D]
        m = jnp.mean(xb, axis=-1, keepdims=True)
        var = jnp.mean((xb - m) ** 2, axis=-1, keepdims=True)
        pieces.append((xb - m) * jax.lax.rsqrt(var + 1e-5))
    xn = jnp.concatenate(pieces, axis=-1) * gamma + beta     # (TS, BD)

    # ---- shared proj + SiLU gate (output duplicated over dir -> dense lanes) ----
    y = mm(xn, wp_ref[...]) + bp                             # (TS, E)
    z = _silu(y)                                             # (TS, E) gate

    # ---- fused fwd/bwd conv1d (k=1) + softplus, both dirs in one matmul ----
    u = _softplus(mm(y[:, 0:BD], wfb_ref[...]) + bfb)        # (TS, E)

    # ---- SSM projections: delta (dt_proj folded) and B|C, 128-lane result tiles ----
    delta = _softplus(mm(u, wd_ref[...]) + bdt)              # (TS, E)
    bc = mm(u, wbc_ref[...])                                 # (TS, 2GN)
    du = delta * u                                           # (TS, E)

    # ---- stage per-chunk scan operands in VMEM scratch (bounds vreg pressure) ----
    da_ref[...] = jnp.exp(delta[:, None, :] * A_l[None, :, :])   # (TS, N, E)

    def expand(Mc):   # (TS, G*N) -> (TS, N, E): each group's N scalars over its ED lanes
        # NOTE: the lane->sublane move is intrinsic; at production sizes bake the
        # replication into wbc or split groups over a grid axis instead.
        blocks = [
            jnp.broadcast_to(Mc[:, g * N:(g + 1) * N][:, :, None], (TS, N, ED))
            for g in range(G)
        ]
        return jnp.concatenate(blocks, axis=-1)

    bx_ref[...] = du[:, None, :] * expand(bc[:, 0:GN])       # (TS, N, E)
    cb_ref[...] = expand(bc[:, GN:2 * GN])                   # (TS, N, E)

    # ---- carried recurrent state across time chunks ----
    @pl.when(pl.program_id(0) == 0)
    def _():
        h_ref[...] = jnp.zeros_like(h_ref)

    # ---- serial scan with fused C-contraction (no H materialization) ----
    def scan_body(t, h):
        h = da_ref[t] * h + bx_ref[t]                        # (N, E)
        y_ref[t, :] = jnp.sum(h * cb_ref[t], axis=0)         # (E,)
        return h

    # TS is small (8 here); for larger chunks use unroll=8.
    h_ref[...] = jax.lax.fori_loop(0, TS, scan_body, h_ref[...], unroll=True)

    # ---- dense 128-lane epilogue: D-skip, fwd+bwd via lane roll, gate, residual ----
    Y = y_ref[...] + Dlane * u                               # (TS, E)
    out = (Y + pltpu.roll(Y, shift=BD, axis=1)) * z + xin    # (TS, E)
    o_ref[...] = out.astype(o_ref.dtype)


# ----------------------------- wrapper / packing -----------------------------
def _pack_params(p, B):
    f32 = jnp.float32
    D = p["wp"].shape[0]
    ED, dt_rank = p["wdt"].shape
    N = p["alog"].shape[1]
    assert ED == D, "VisionEncoderMambaBlock requires dim_inner == dim"
    G = 2 * B
    BD = B * D
    E = G * ED
    GN = G * N

    wpT = p["wp"].T.astype(f32)
    wfT = p["wf"].T.astype(f32)
    wbT = p["wb"].T.astype(f32)
    wdbcT = p["wdbc"].T.astype(f32)              # (D, dt_rank + 2N)
    wdtT = p["wdt"].T.astype(f32)                # (dt_rank, ED)

    # exact fusion of dt_proj into the delta projection
    W_delta = wdbcT[:, :dt_rank] @ wdtT          # (D, ED)
    W_B = wdbcT[:, dt_rank:dt_rank + N]          # (D, N)
    W_C = wdbcT[:, dt_rank + N:]                 # (D, N)

    I_B = jnp.eye(B, dtype=f32)
    I_G = jnp.eye(G, dtype=f32)

    # group/lane order everywhere: (dir, batch, feature)
    Wp2 = jnp.tile(jnp.kron(I_B, wpT), (1, 2))                               # (BD, E)
    Wfb2 = jnp.concatenate([jnp.kron(I_B, wfT), jnp.kron(I_B, wbT)], axis=1)  # (BD, E)
    Wd2 = jnp.kron(I_G, W_delta)                                             # (E, E)
    Wbc2 = jnp.concatenate([jnp.kron(I_G, W_B), jnp.kron(I_G, W_C)], axis=1)  # (E, 2GN)

    # f32 vector slab (no column padding beyond E): rows 0..5 params, 6..7 pad, 8.. = A
    gamma = jnp.tile(p["gamma"], B)                                           # (BD,)
    beta = jnp.tile(p["beta"], B)
    bp = jnp.tile(p["bp"], G)                                                 # (E,)
    bfb = jnp.concatenate([jnp.tile(p["bf"], B), jnp.tile(p["bb"], B)])       # (E,)
    bdt = jnp.tile(p["bdt"], G)                                               # (E,)
    Dlane = jnp.tile(p["dpar"], G)                                            # (E,)
    A_lane = jnp.tile((-jnp.exp(p["alog"])).T, (1, G)).astype(f32)            # (N, E)

    def row(v):
        v = v.astype(f32)
        return jnp.pad(v, (0, E - v.shape[0]))[None, :]

    vslab = jnp.concatenate(
        [row(gamma), row(beta), row(bp), row(bfb), row(bdt), row(Dlane),
         jnp.zeros((2, E), f32), A_lane],
        axis=0)                                                               # (8+N, E)

    bf16 = jnp.bfloat16
    return (Wp2.astype(bf16), Wfb2.astype(bf16), Wd2.astype(bf16),
            Wbc2.astype(bf16), vslab, dict(D=D, N=N, E=E))


def vim_block(x, params, *, ts=8):
    B, S, D = x.shape
    wp2, wfb2, wd2, wbc2, vslab, cfg = _pack_params(params, B)
    N, E = cfg["N"], cfg["E"]
    BD = B * D
    assert S % ts == 0, "S must be a multiple of the time chunk (pad/mask tails)"
    nchunks = S // ts

    # Time-major, lane-dense activation layout, duplicated over the two scan
    # directions so every in-kernel op and the output store are E=2*B*D lanes.
    # TODO(synk): at production sizes fuse this relayout into the upstream
    # producer (or express via the in_spec index_map) instead of an extra pass.
    x_tm = jnp.transpose(x, (1, 0, 2)).reshape(S, BD)
    x_dup = jnp.concatenate([x_tm, x_tm], axis=-1)                            # (S, E)

    kern = functools.partial(vim_block_kernel, B=B, D=D, N=N, TS=ts)
    out_dup = pl.pallas_call(
        kern,
        out_shape=jax.ShapeDtypeStruct((S, E), x.dtype),
        grid=(nchunks,),
        in_specs=[
            pl.BlockSpec((ts, E), lambda c: (c, 0)),        # activations (pipelined)
            pl.BlockSpec(wp2.shape, lambda c: (0, 0)),      # weights: resident
            pl.BlockSpec(wfb2.shape, lambda c: (0, 0)),
            pl.BlockSpec(wd2.shape, lambda c: (0, 0)),
            pl.BlockSpec(wbc2.shape, lambda c: (0, 0)),
            pl.BlockSpec(vslab.shape, lambda c: (0, 0)),
        ],
        out_specs=pl.BlockSpec((ts, E), lambda c: (c, 0)),
        scratch_shapes=[
            pltpu.VMEM((N, E), jnp.float32),                # carried SSM state h
            pltpu.VMEM((ts, N, E), jnp.float32),            # exp(delta*A)
            pltpu.VMEM((ts, N, E), jnp.float32),            # delta*u*B
            pltpu.VMEM((ts, N, E), jnp.float32),            # C (broadcast)
            pltpu.VMEM((ts, E), jnp.float32),               # per-chunk scan output
        ],
        compiler_params=pltpu.CompilerParams(
            dimension_semantics=("arbitrary",)),            # h carried across chunks
    )(x_dup, wp2, wfb2, wd2, wbc2, vslab)

    out_tm = out_dup[:, :BD]                                # both dir halves identical
    return out_tm.reshape(S, B, D).transpose(1, 0, 2)


# ----------------------------- pure-JAX reference -----------------------------
def vim_block_ref(x, p):
    hi = jax.lax.Precision.HIGHEST
    dt_rank = p["wdt"].shape[1]
    N = p["alog"].shape[1]

    mean = x.mean(-1, keepdims=True)
    var = ((x - mean) ** 2).mean(-1, keepdims=True)
    xn = (x - mean) / jnp.sqrt(var + 1e-5) * p["gamma"] + p["beta"]
    y = jnp.matmul(xn, p["wp"].T, precision=hi) + p["bp"]
    A = -jnp.exp(p["alog"])
    Dp = p["dpar"]

    def ssm(u):                                   # u: (B, S, ED)
        dbc = jnp.matmul(u, p["wdbc"].T, precision=hi)
        delta = _softplus(
            jnp.matmul(dbc[..., :dt_rank], p["wdt"].T, precision=hi) + p["bdt"])
        Bm = dbc[..., dt_rank:dt_rank + N]
        Cm = dbc[..., dt_rank + N:]
        dA = jnp.exp(delta[..., None] * A)
        BX = (delta * u)[..., None] * Bm[:, :, None, :]
        h = jnp.zeros((u.shape[0],) + A.shape, jnp.float32)
        ys = []
        for t in range(u.shape[1]):
            h = dA[:, t] * h + BX[:, t]
            ys.append((h * Cm[:, t][:, None, :]).sum(-1) + Dp * u[:, t])
        return jnp.stack(ys, axis=1)

    u_f = _softplus(jnp.matmul(y, p["wf"].T, precision=hi) + p["bf"])
    u_b = _softplus(jnp.matmul(y, p["wb"].T, precision=hi) + p["bb"])
    z = _silu(y)
    return ssm(u_f) * z + ssm(u_b) * z + x


# ----------------------------- demo / self-test -----------------------------
if __name__ == "__main__":
    # Module config (dim_inner must equal dim, as the reference code requires).
    dim, dt_rank, dim_inner, d_state = 32, 8, 32, 16
    B, S = 2, 16

    key = jax.random.PRNGKey(0)
    keys = jax.random.split(key, 16)

    def w(k, shape, scale=0.05):
        return (scale * jax.random.normal(k, shape)).astype(jnp.float32)

    x = jax.random.normal(keys[0], (B, S, dim), jnp.float32)

    params = dict(
        gamma=jnp.ones((dim,), jnp.float32),
        beta=jnp.zeros((dim,), jnp.float32),
        wp=w(keys[1], (dim, dim)),                          # nn.Linear (out, in)
        bp=w(keys[2], (dim,)),
        wf=w(keys[3], (dim, dim)),                          # Conv1d k=1 -> (out, in)
        bf=w(keys[4], (dim,)),
        wb=w(keys[5], (dim, dim)),
        bb=w(keys[6], (dim,)),
        wdbc=w(keys[7], (dt_rank + 2 * d_state, dim)),      # deltaBC Linear, no bias
        wdt=w(keys[8], (dim_inner, dt_rank)),               # dt_proj Linear
        bdt=w(keys[9], (dim_inner,)),
        alog=jnp.log(jnp.tile(
            jnp.arange(1, d_state + 1, dtype=jnp.float32)[None, :], (dim_inner, 1))),
        dpar=jnp.ones((dim_inner,), jnp.float32),
    )

    out = jax.block_until_ready(vim_block(x, params, ts=8))
    ref = vim_block_ref(x, params)

    assert out.shape == (B, S, dim) and out.dtype == jnp.float32
    max_err = float(jnp.abs(out - ref).max())
    assert jnp.allclose(out, ref, rtol=2e-2, atol=2e-2), max_err

    print("KERNEL_OK")
</pallas_src>

<mosaic_0001>
module attributes {stable_mosaic.version = 11 : i64} {
  func.func @vim_block_kernel(%arg0: i32, %arg1: memref<8x128xf32, #tpu.memory_space<vmem>>, %arg2: memref<64x128xbf16, #tpu.memory_space<vmem>>, %arg3: memref<64x128xbf16, #tpu.memory_space<vmem>>, %arg4: memref<128x128xbf16, #tpu.memory_space<vmem>>, %arg5: memref<128x128xbf16, #tpu.memory_space<vmem>>, %arg6: memref<24x128xf32, #tpu.memory_space<vmem>>, %arg7: memref<8x128xf32, #tpu.memory_space<vmem>>, %arg8: memref<16x128xf32, #tpu.memory_space<vmem>>, %arg9: memref<8x16x128xf32, #tpu.memory_space<vmem>>, %arg10: memref<8x16x128xf32, #tpu.memory_space<vmem>>, %arg11: memref<8x16x128xf32, #tpu.memory_space<vmem>>, %arg12: memref<8x128xf32, #tpu.memory_space<vmem>>) attributes {dimension_semantics = [#tpu.dimension_semantics<arbitrary>], iteration_bounds = array<i64: 2>, scalar_prefetch = 0 : i64, scratch_operands = 5 : i64, tpu.core_type = #tpu.core_type<tc>, window_params = [{transform_indices = @transform_0, window_bounds = array<i64: 8, 128>}, {pipeline_mode = #tpu.pipeline_mode<synchronous>, transform_indices = @transform_1, window_bounds = array<i64: 64, 128>}, {pipeline_mode = #tpu.pipeline_mode<synchronous>, transform_indices = @transform_2, window_bounds = array<i64: 64, 128>}, {pipeline_mode = #tpu.pipeline_mode<synchronous>, transform_indices = @transform_3, window_bounds = array<i64: 128, 128>}, {pipeline_mode = #tpu.pipeline_mode<synchronous>, transform_indices = @transform_4, window_bounds = array<i64: 128, 128>}, {pipeline_mode = #tpu.pipeline_mode<synchronous>, transform_indices = @transform_5, window_bounds = array<i64: 24, 128>}, {transform_indices = @transform_6, window_bounds = array<i64: 8, 128>}]} {
    %c0 = arith.constant 0 : index
    %c0_0 = arith.constant 0 : index
    %0 = vector.load %arg1[%c0, %c0_0] : memref<8x128xf32, #tpu.memory_space<vmem>>, vector<8x128xf32>
    %c0_1 = arith.constant 0 : index
    %c0_2 = arith.constant 0 : index
    %1 = vector.load %arg6[%c0_1, %c0_2] : memref<24x128xf32, #tpu.memory_space<vmem>>, vector<1x64xf32>
    %c1 = arith.constant 1 : index
    %c0_3 = arith.constant 0 : index
    %2 = vector.load %arg6[%c1, %c0_3] : memref<24x128xf32, #tpu.memory_space<vmem>>, vector<1x64xf32>
    %c2 = arith.constant 2 : index
    %c0_4 = arith.constant 0 : index
    %3 = vector.load %arg6[%c2, %c0_4] : memref<24x128xf32, #tpu.memory_space<vmem>>, vector<1x128xf32>
    %c3 = arith.constant 3 : index
    %c0_5 = arith.constant 0 : index
    %4 = vector.load %arg6[%c3, %c0_5] : memref<24x128xf32, #tpu.memory_space<vmem>>, vector<1x128xf32>
    %c4 = arith.constant 4 : index
    %c0_6 = arith.constant 0 : index
    %5 = vector.load %arg6[%c4, %c0_6] : memref<24x128xf32, #tpu.memory_space<vmem>>, vector<1x128xf32>
    %c5 = arith.constant 5 : index
    %c0_7 = arith.constant 0 : index
    %6 = vector.load %arg6[%c5, %c0_7] : memref<24x128xf32, #tpu.memory_space<vmem>>, vector<1x128xf32>
    %c8 = arith.constant 8 : index
    %c0_8 = arith.constant 0 : index
    %7 = vector.load %arg6[%c8, %c0_8] : memref<24x128xf32, #tpu.memory_space<vmem>>, vector<16x128xf32>
    %8 = vector.extract_strided_slice %0 {offsets = [0, 0], sizes = [8, 32], strides = [1, 1]} : vector<8x128xf32> to vector<8x32xf32>
    %cst = arith.constant dense<0.000000e+00> : vector<8xf32>
    %9 = vector.multi_reduction <add>, %8, %cst [1] : vector<8x32xf32> to vector<8xf32>
    %10 = vector.shape_cast %9 : vector<8xf32> to vector<8x1xf32>
    %cst_9 = arith.constant 3.200000e+01 : f32
    %11 = vector.broadcast %cst_9 : f32 to vector<8x1xf32>
    %12 = arith.divf %10, %11 : vector<8x1xf32>
    %13 = vector.broadcast %12 : vector<8x1xf32> to vector<8x32xf32>
    %14 = arith.subf %8, %13 : vector<8x32xf32>
    %15 = arith.mulf %14, %14 : vector<8x32xf32>
    %cst_10 = arith.constant dense<0.000000e+00> : vector<8xf32>
    %16 = vector.multi_reduction <add>, %15, %cst_10 [1] : vector<8x32xf32> to vector<8xf32>
    %17 = vector.shape_cast %16 : vector<8xf32> to vector<8x1xf32>
    %cst_11 = arith.constant 3.200000e+01 : f32
    %18 = vector.broadcast %cst_11 : f32 to vector<8x1xf32>
    %19 = arith.divf %17, %18 : vector<8x1xf32>
    %20 = vector.broadcast %12 : vector<8x1xf32> to vector<8x32xf32>
    %21 = arith.subf %8, %20 : vector<8x32xf32>
    %cst_12 = arith.constant 9.99999974E-6 : f32
    %22 = vector.broadcast %cst_12 : f32 to vector<8x1xf32>
    %23 = arith.addf %19, %22 : vector<8x1xf32>
    %24 = math.rsqrt %23 : vector<8x1xf32>
    %25 = vector.broadcast %24 : vector<8x1xf32> to vector<8x32xf32>
    %26 = arith.mulf %21, %25 : vector<8x32xf32>
    %27 = vector.extract_strided_slice %0 {offsets = [0, 32], sizes = [8, 32], strides = [1, 1]} : vector<8x128xf32> to vector<8x32xf32>
    %cst_13 = arith.constant dense<0.000000e+00> : vector<8xf32>
    %28 = vector.multi_reduction <add>, %27, %cst_13 [1] : vector<8x32xf32> to vector<8xf32>
    %29 = vector.shape_cast %28 : vector<8xf32> to vector<8x1xf32>
    %cst_14 = arith.constant 3.200000e+01 : f32
    %30 = vector.broadcast %cst_14 : f32 to vector<8x1xf32>
    %31 = arith.divf %29, %30 : vector<8x1xf32>
    %32 = vector.broadcast %31 : vector<8x1xf32> to vector<8x32xf32>
    %33 = arith.subf %27, %32 : vector<8x32xf32>
    %34 = arith.mulf %33, %33 : vector<8x32xf32>
    %cst_15 = arith.constant dense<0.000000e+00> : vector<8xf32>
    %35 = vector.multi_reduction <add>, %34, %cst_15 [1] : vector<8x32xf32> to vector<8xf32>
    %36 = vector.shape_cast %35 : vector<8xf32> to vector<8x1xf32>
    %cst_16 = arith.constant 3.200000e+01 : f32
    %37 = vector.broadcast %cst_16 : f32 to vector<8x1xf32>
    %38 = arith.divf %36, %37 : vector<8x1xf32>
    %39 = vector.broadcast %31 : vector<8x1xf32> to vector<8x32xf32>
    %40 = arith.subf %27, %39 : vector<8x32xf32>
    %cst_17 = arith.constant 9.99999974E-6 : f32
    %41 = vector.broadcast %cst_17 : f32 to vector<8x1xf32>
    %42 = arith.addf %38, %41 : vector<8x1xf32>
    %43 = math.rsqrt %42 : vector<8x1xf32>
    %44 = vector.broadcast %43 : vector<8x1xf32> to vector<8x32xf32>
    %45 = arith.mulf %40, %44 : vector<8x32xf32>
    %46 = tpu.concatenate %26, %45 in 1 : vector<8x32xf32>, vector<8x32xf32> -> vector<8x64xf32>
    %47 = vector.broadcast %1 : vector<1x64xf32> to vector<8x64xf32>
    %48 = arith.mulf %46, %47 : vector<8x64xf32>
    %49 = vector.broadcast %2 : vector<1x64xf32> to vector<8x64xf32>
    %50 = arith.addf %48, %49 : vector<8x64xf32>
    %c0_18 = arith.constant 0 : index
    %c0_19 = arith.constant 0 : index
    %51 = vector.load %arg2[%c0_18, %c0_19] : memref<64x128xbf16, #tpu.memory_space<vmem>>, vector<64x128xbf16>
    %52 = arith.truncf %50 : vector<8x64xf32> to vector<8x64xbf16>
    %cst_20 = arith.constant dense<0.000000e+00> : vector<8x128xf32>
    %53 = tpu.matmul %52, %51, %cst_20 {dimension_numbers = #tpu.dot_dimension_numbers<[1], [0], [0], [1], [0, 0, 1, 1], [], []>} : vector<8x64xbf16>, vector<64x128xbf16>, vector<8x128xf32> -> vector<8x128xf32>
    %54 = vector.broadcast %3 : vector<1x128xf32> to vector<8x128xf32>
    %55 = arith.addf %53, %54 : vector<8x128xf32>
    %cst_21 = arith.constant 0.000000e+00 : f32
    %56 = vector.broadcast %cst_21 : f32 to vector<8x128xf32>
    %57 = arith.subf %56, %55 : vector<8x128xf32>
    %58 = math.exp %57 : vector<8x128xf32>
    %cst_22 = arith.constant 1.000000e+00 : f32
    %59 = vector.broadcast %cst_22 : f32 to vector<8x128xf32>
    %60 = arith.addf %59, %58 : vector<8x128xf32>
    %cst_23 = arith.constant 1.000000e+00 : f32
    %61 = vector.broadcast %cst_23 : f32 to vector<8x128xf32>
    %62 = arith.divf %61, %60 : vector<8x128xf32>
    %63 = arith.mulf %55, %62 : vector<8x128xf32>
    %64 = vector.extract_strided_slice %55 {offsets = [0, 0], sizes = [8, 64], strides = [1, 1]} : vector<8x128xf32> to vector<8x64xf32>
    %c0_24 = arith.constant 0 : index
    %c0_25 = arith.constant 0 : index
    %65 = vector.load %arg3[%c0_24, %c0_25] : memref<64x128xbf16, #tpu.memory_space<vmem>>, vector<64x128xbf16>
    %66 = arith.truncf %64 : vector<8x64xf32> to vector<8x64xbf16>
    %cst_26 = arith.constant dense<0.000000e+00> : vector<8x128xf32>
    %67 = tpu.matmul %66, %65, %cst_26 {dimension_numbers = #tpu.dot_dimension_numbers<[1], [0], [0], [1], [0, 0, 1, 1], [], []>} : vector<8x64xbf16>, vector<64x128xbf16>, vector<8x128xf32> -> vector<8x128xf32>
    %68 = vector.broadcast %4 : vector<1x128xf32> to vector<8x128xf32>
    %69 = arith.addf %67, %68 : vector<8x128xf32>
    %cst_27 = arith.constant 2.000000e+01 : f32
    %70 = vector.broadcast %cst_27 : f32 to vector<8x128xf32>
    %71 = arith.cmpf ogt, %69, %70 : vector<8x128xf32>
    %cst_28 = arith.constant 2.000000e+01 : f32
    %72 = vector.broadcast %cst_28 : f32 to vector<8x128xf32>
    %73 = arith.minimumf %69, %72 : vector<8x128xf32>
    %74 = math.exp %73 : vector<8x128xf32>
    %cst_29 = arith.constant 1.000000e+00 : f32
    %75 = vector.broadcast %cst_29 : f32 to vector<8x128xf32>
    %76 = arith.addf %75, %74 : vector<8x128xf32>
    %77 = math.log %76 : vector<8x128xf32>
    %78 = arith.select %71, %69, %77 : vector<8x128xi1>, vector<8x128xf32>
    %c0_30 = arith.constant 0 : index
    %c0_31 = arith.constant 0 : index
    %79 = vector.load %arg4[%c0_30, %c0_31] : memref<128x128xbf16, #tpu.memory_space<vmem>>, vector<128x128xbf16>
    %80 = arith.truncf %78 : vector<8x128xf32> to vector<8x128xbf16>
    %cst_32 = arith.constant dense<0.000000e+00> : vector<8x128xf32>
    %81 = tpu.matmul %80, %79, %cst_32 {dimension_numbers = #tpu.dot_dimension_numbers<[1], [0], [0], [1], [0, 0, 1, 1], [], []>} : vector<8x128xbf16>, vector<128x128xbf16>, vector<8x128xf32> -> vector<8x128xf32>
    %82 = vector.broadcast %5 : vector<1x128xf32> to vector<8x128xf32>
    %83 = arith.addf %81, %82 : vector<8x128xf32>
    %cst_33 = arith.constant 2.000000e+01 : f32
    %84 = vector.broadcast %cst_33 : f32 to vector<8x128xf32>
    %85 = arith.cmpf ogt, %83, %84 : vector<8x128xf32>
    %cst_34 = arith.constant 2.000000e+01 : f32
    %86 = vector.broadcast %cst_34 : f32 to vector<8x128xf32>
    %87 = arith.minimumf %83, %86 : vector<8x128xf32>
    %88 = math.exp %87 : vector<8x128xf32>
    %cst_35 = arith.constant 1.000000e+00 : f32
    %89 = vector.broadcast %cst_35 : f32 to vector<8x128xf32>
    %90 = arith.addf %89, %88 : vector<8x128xf32>
    %91 = math.log %90 : vector<8x128xf32>
    %92 = arith.select %85, %83, %91 : vector<8x128xi1>, vector<8x128xf32>
    %c0_36 = arith.constant 0 : index
    %c0_37 = arith.constant 0 : index
    %93 = vector.load %arg5[%c0_36, %c0_37] : memref<128x128xbf16, #tpu.memory_space<vmem>>, vector<128x128xbf16>
    %94 = arith.truncf %78 : vector<8x128xf32> to vector<8x128xbf16>
    %cst_38 = arith.constant dense<0.000000e+00> : vector<8x128xf32>
    %95 = tpu.matmul %94, %93, %cst_38 {dimension_numbers = #tpu.dot_dimension_numbers<[1], [0], [0], [1], [0, 0, 1, 1], [], []>} : vector<8x128xbf16>, vector<128x128xbf16>, vector<8x128xf32> -> vector<8x128xf32>
    %96 = arith.mulf %92, %78 : vector<8x128xf32>
    %97 = vector.shape_cast %92 : vector<8x128xf32> to vector<8x1x128xf32>
    %98 = vector.shape_cast %7 : vector<16x128xf32> to vector<1x16x128xf32>
    %99 = vector.broadcast %97 : vector<8x1x128xf32> to vector<8x16x128xf32>
    %100 = vector.broadcast %98 : vector<1x16x128xf32> to vector<8x16x128xf32>
    %101 = arith.mulf %99, %100 : vector<8x16x128xf32>
    %102 = math.exp %101 : vector<8x16x128xf32>
    %c0_39 = arith.constant 0 : index
    %c0_40 = arith.constant 0 : index
    %c0_41 = arith.constant 0 : index
    %103 = vector.load %arg9[%c0_39, %c0_40, %c0_41] : memref<8x16x128xf32, #tpu.memory_space<vmem>>, vector<8x16x128xf32>
    tpu.vector_store %arg9[%c0_39, %c0_40, %c0_41], %102 {strides = array<i32>} : memref<8x16x128xf32, #tpu.memory_space<vmem>>, vector<8x16x128xf32>,
    %104 = vector.shape_cast %96 : vector<8x128xf32> to vector<8x1x128xf32>
    %105 = vector.extract_strided_slice %95 {offsets = [0, 0], sizes = [8, 64], strides = [1, 1]} : vector<8x128xf32> to vector<8x64xf32>
    %106 = vector.extract_strided_slice %105 {offsets = [0, 0], sizes = [8, 16], strides = [1, 1]} : vector<8x64xf32> to vector<8x16xf32>
    %107 = vector.shape_cast %106 : vector<8x16xf32> to vector<8x16x1xf32>
    %108 = vector.shape_cast %107 : vector<8x16x1xf32> to vector<8x16x1xf32>
    %109 = vector.broadcast %108 : vector<8x16x1xf32> to vector<8x16x32xf32>
    %110 = vector.extract_strided_slice %105 {offsets = [0, 16], sizes = [8, 16], strides = [1, 1]} : vector<8x64xf32> to vector<8x16xf32>
    %111 = vector.shape_cast %110 : vector<8x16xf32> to vector<8x16x1xf32>
    %112 = vector.shape_cast %111 : vector<8x16x1xf32> to vector<8x16x1xf32>
    %113 = vector.broadcast %112 : vector<8x16x1xf32> to vector<8x16x32xf32>
    %114 = vector.extract_strided_slice %105 {offsets = [0, 32], sizes = [8, 16], strides = [1, 1]} : vector<8x64xf32> to vector<8x16xf32>
    %115 = vector.shape_cast %114 : vector<8x16xf32> to vector<8x16x1xf32>
    %116 = vector.shape_cast %115 : vector<8x16x1xf32> to vector<8x16x1xf32>
    %117 = vector.broadcast %116 : vector<8x16x1xf32> to vector<8x16x32xf32>
    %118 = vector.extract_strided_slice %105 {offsets = [0, 48], sizes = [8, 16], strides = [1, 1]} : vector<8x64xf32> to vector<8x16xf32>
    %119 = vector.shape_cast %118 : vector<8x16xf32> to vector<8x16x1xf32>
    %120 = vector.shape_cast %119 : vector<8x16x1xf32> to vector<8x16x1xf32>
    %121 = vector.broadcast %120 : vector<8x16x1xf32> to vector<8x16x32xf32>
    %122 = tpu.concatenate %109, %113, %117, %121 in 2 : vector<8x16x32xf32>, vector<8x16x32xf32>, vector<8x16x32xf32>, vector<8x16x32xf32> -> vector<8x16x128xf32>
    %123 = vector.broadcast %104 : vector<8x1x128xf32> to vector<8x16x128xf32>
    %124 = arith.mulf %123, %122 : vector<8x16x128xf32>
    %c0_42 = arith.constant 0 : index
    %c0_43 = arith.constant 0 : index
    %c0_44 = arith.constant 0 : index
    %125 = vector.load %arg10[%c0_42, %c0_43, %c0_44] : memref<8x16x128xf32, #tpu.memory_space<vmem>>, vector<8x16x128xf32>
    tpu.vector_store %arg10[%c0_42, %c0_43, %c0_44], %124 {strides = array<i32>} : memref<8x16x128xf32, #tpu.memory_space<vmem>>, vector<8x16x128xf32>,
    %126 = vector.extract_strided_slice %95 {offsets = [0, 64], sizes = [8, 64], strides = [1, 1]} : vector<8x128xf32> to vector<8x64xf32>
    %127 = vector.extract_strided_slice %126 {offsets = [0, 0], sizes = [8, 16], strides = [1, 1]} : vector<8x64xf32> to vector<8x16xf32>
    %128 = vector.shape_cast %127 : vector<8x16xf32> to vector<8x16x1xf32>
    %129 = vector.shape_cast %128 : vector<8x16x1xf32> to vector<8x16x1xf32>
    %130 = vector.broadcast %129 : vector<8x16x1xf32> to vector<8x16x32xf32>
    %131 = vector.extract_strided_slice %126 {offsets = [0, 16], sizes = [8, 16], strides = [1, 1]} : vector<8x64xf32> to vector<8x16xf32>
    %132 = vector.shape_cast %131 : vector<8x16xf32> to vector<8x16x1xf32>
    %133 = vector.shape_cast %132 : vector<8x16x1xf32> to vector<8x16x1xf32>
    %134 = vector.broadcast %133 : vector<8x16x1xf32> to vector<8x16x32xf32>
    %135 = vector.extract_strided_slice %126 {offsets = [0, 32], sizes = [8, 16], strides = [1, 1]} : vector<8x64xf32> to vector<8x16xf32>
    %136 = vector.shape_cast %135 : vector<8x16xf32> to vector<8x16x1xf32>
    %137 = vector.shape_cast %136 : vector<8x16x1xf32> to vector<8x16x1xf32>
    %138 = vector.broadcast %137 : vector<8x16x1xf32> to vector<8x16x32xf32>
    %139 = vector.extract_strided_slice %126 {offsets = [0, 48], sizes = [8, 16], strides = [1, 1]} : vector<8x64xf32> to vector<8x16xf32>
    %140 = vector.shape_cast %139 : vector<8x16xf32> to vector<8x16x1xf32>
    %141 = vector.shape_cast %140 : vector<8x16x1xf32> to vector<8x16x1xf32>
    %142 = vector.broadcast %141 : vector<8x16x1xf32> to vector<8x16x32xf32>
    %143 = tpu.concatenate %130, %134, %138, %142 in 2 : vector<8x16x32xf32>, vector<8x16x32xf32>, vector<8x16x32xf32>, vector<8x16x32xf32> -> vector<8x16x128xf32>
    %c0_45 = arith.constant 0 : index
    %c0_46 = arith.constant 0 : index
    %c0_47 = arith.constant 0 : index
    %144 = vector.load %arg11[%c0_45, %c0_46, %c0_47] : memref<8x16x128xf32, #tpu.memory_space<vmem>>, vector<8x16x128xf32>
    tpu.vector_store %arg11[%c0_45, %c0_46, %c0_47], %143 {strides = array<i32>} : memref<8x16x128xf32, #tpu.memory_space<vmem>>, vector<8x16x128xf32>,
    %c0_i32 = arith.constant 0 : i32
    %145 = arith.cmpi eq, %arg0, %c0_i32 : i32
    %146 = arith.extui %145 : i1 to i32
    %c0_i32_48 = arith.constant 0 : i32
    %147 = arith.cmpi ne, %146, %c0_i32_48 : i32
    scf.if %147 {
      %cst_122 = arith.constant 0.000000e+00 : f32
      %295 = vector.broadcast %cst_122 : f32 to vector<16x128xf32>
      %c0_123 = arith.constant 0 : index
      %c0_124 = arith.constant 0 : index
      %296 = vector.load %arg8[%c0_123, %c0_124] : memref<16x128xf32, #tpu.memory_space<vmem>>, vector<16x128xf32>
      tpu.vector_store %arg8[%c0_123, %c0_124], %295 {strides = array<i32>} : memref<16x128xf32, #tpu.memory_space<vmem>>, vector<16x128xf32>,
    } else {
    }
    %c0_49 = arith.constant 0 : index
    %c0_50 = arith.constant 0 : index
    %148 = vector.load %arg8[%c0_49, %c0_50] : memref<16x128xf32, #tpu.memory_space<vmem>>, vector<16x128xf32>
    %c0_i32_51 = arith.constant 0 : i32
    %149 = arith.index_cast %c0_i32_51 : i32 to index
    %c0_52 = arith.constant 0 : index
    %c0_53 = arith.constant 0 : index
    %150 = vector.load %arg9[%149, %c0_52, %c0_53] : memref<8x16x128xf32, #tpu.memory_space<vmem>>, vector<1x16x128xf32>
    %151 = vector.shape_cast %150 : vector<1x16x128xf32> to vector<16x128xf32>
    %152 = arith.mulf %151, %148 : vector<16x128xf32>
    %153 = arith.index_cast %c0_i32_51 : i32 to index
    %c0_54 = arith.constant 0 : index
    %c0_55 = arith.constant 0 : index
    %154 = vector.load %arg10[%153, %c0_54, %c0_55] : memref<8x16x128xf32, #tpu.memory_space<vmem>>, vector<1x16x128xf32>
    %155 = vector.shape_cast %154 : vector<1x16x128xf32> to vector<16x128xf32>
    %156 = arith.addf %152, %155 : vector<16x128xf32>
    %157 = arith.index_cast %c0_i32_51 : i32 to index
    %c0_56 = arith.constant 0 : index
    %c0_57 = arith.constant 0 : index
    %158 = vector.load %arg11[%157, %c0_56, %c0_57] : memref<8x16x128xf32, #tpu.memory_space<vmem>>, vector<1x16x128xf32>
    %159 = vector.shape_cast %158 : vector<1x16x128xf32> to vector<16x128xf32>
    %160 = arith.mulf %156, %159 : vector<16x128xf32>
    %cst_58 = arith.constant dense<0.000000e+00> : vector<128xf32>
    %161 = vector.multi_reduction <add>, %160, %cst_58 [0] : vector<16x128xf32> to vector<128xf32>
    %162 = arith.index_cast %c0_i32_51 : i32 to index
    %c0_59 = arith.constant 0 : index
    %163 = vector.load %arg12[%162, %c0_59] : memref<8x128xf32, #tpu.memory_space<vmem>>, vector<1x128xf32>
    %164 = vector.shape_cast %163 : vector<1x128xf32> to vector<128xf32>
    %165 = vector.shape_cast %161 : vector<128xf32> to vector<1x128xf32>
    tpu.vector_store %arg12[%162, %c0_59], %165 {strides = array<i32>} : memref<8x128xf32, #tpu.memory_space<vmem>>, vector<1x128xf32>,
    %c1_i32 = arith.constant 1 : i32
    %166 = arith.index_cast %c1_i32 : i32 to index
    %c0_60 = arith.constant 0 : index
    %c0_61 = arith.constant 0 : index
    %167 = vector.load %arg9[%166, %c0_60, %c0_61] : memref<8x16x128xf32, #tpu.memory_space<vmem>>, vector<1x16x128xf32>
    %168 = vector.shape_cast %167 : vector<1x16x128xf32> to vector<16x128xf32>
    %169 = arith.mulf %168, %156 : vector<16x128xf32>
    %170 = arith.index_cast %c1_i32 : i32 to index
    %c0_62 = arith.constant 0 : index
    %c0_63 = arith.constant 0 : index
    %171 = vector.load %arg10[%170, %c0_62, %c0_63] : memref<8x16x128xf32, #tpu.memory_space<vmem>>, vector<1x16x128xf32>
    %172 = vector.shape_cast %171 : vector<1x16x128xf32> to vector<16x128xf32>
    %173 = arith.addf %169, %172 : vector<16x128xf32>
    %174 = arith.index_cast %c1_i32 : i32 to index
    %c0_64 = arith.constant 0 : index
    %c0_65 = arith.constant 0 : index
    %175 = vector.load %arg11[%174, %c0_64, %c0_65] : memref<8x16x128xf32, #tpu.memory_space<vmem>>, vector<1x16x128xf32>
    %176 = vector.shape_cast %175 : vector<1x16x128xf32> to vector<16x128xf32>
    %177 = arith.mulf %173, %176 : vector<16x128xf32>
    %cst_66 = arith.constant dense<0.000000e+00> : vector<128xf32>
    %178 = vector.multi_reduction <add>, %177, %cst_66 [0] : vector<16x128xf32> to vector<128xf32>
    %179 = arith.index_cast %c1_i32 : i32 to index
    %c0_67 = arith.constant 0 : index
    %180 = vector.load %arg12[%179, %c0_67] : memref<8x128xf32, #tpu.memory_space<vmem>>, vector<1x128xf32>
    %181 = vector.shape_cast %180 : vector<1x128xf32> to vector<128xf32>
    %182 = vector.shape_cast %178 : vector<128xf32> to vector<1x128xf32>
    tpu.vector_store %arg12[%179, %c0_67], %182 {strides = array<i32>} : memref<8x128xf32, #tpu.memory_space<vmem>>, vector<1x128xf32>,
    %c2_i32 = arith.constant 2 : i32
    %183 = arith.index_cast %c2_i32 : i32 to index
    %c0_68 = arith.constant 0 : index
    %c0_69 = arith.constant 0 : index
    %184 = vector.load %arg9[%183, %c0_68, %c0_69] : memref<8x16x128xf32, #tpu.memory_space<vmem>>, vector<1x16x128xf32>
    %185 = vector.shape_cast %184 : vector<1x16x128xf32> to vector<16x128xf32>
    %186 = arith.mulf %185, %173 : vector<16x128xf32>
    %187 = arith.index_cast %c2_i32 : i32 to index
    %c0_70 = arith.constant 0 : index
    %c0_71 = arith.constant 0 : index
    %188 = vector.load %arg10[%187, %c0_70, %c0_71] : memref<8x16x128xf32, #tpu.memory_space<vmem>>, vector<1x16x128xf32>
    %189 = vector.shape_cast %188 : vector<1x16x128xf32> to vector<16x128xf32>
    %190 = arith.addf %186, %189 : vector<16x128xf32>
    %191 = arith.index_cast %c2_i32 : i32 to index
    %c0_72 = arith.constant 0 : index
    %c0_73 = arith.constant 0 : index
    %192 = vector.load %arg11[%191, %c0_72, %c0_73] : memref<8x16x128xf32, #tpu.memory_space<vmem>>, vector<1x16x128xf32>
    %193 = vector.shape_cast %192 : vector<1x16x128xf32> to vector<16x128xf32>
    %194 = arith.mulf %190, %193 : vector<16x128xf32>
    %cst_74 = arith.constant dense<0.000000e+00> : vector<128xf32>
    %195 = vector.multi_reduction <add>, %194, %cst_74 [0] : vector<16x128xf32> to vector<128xf32>
    %196 = arith.index_cast %c2_i32 : i32 to index
    %c0_75 = arith.constant 0 : index
    %197 = vector.load %arg12[%196, %c0_75] : memref<8x128xf32, #tpu.memory_space<vmem>>, vector<1x128xf32>
    %198 = vector.shape_cast %197 : vector<1x128xf32> to vector<128xf32>
    %199 = vector.shape_cast %195 : vector<128xf32> to vector<1x128xf32>
    tpu.vector_store %arg12[%196, %c0_75], %199 {strides = array<i32>} : memref<8x128xf32, #tpu.memory_space<vmem>>, vector<1x128xf32>,
    %c3_i32 = arith.constant 3 : i32
    %200 = arith.index_cast %c3_i32 : i32 to index
    %c0_76 = arith.constant 0 : index
    %c0_77 = arith.constant 0 : index
    %201 = vector.load %arg9[%200, %c0_76, %c0_77] : memref<8x16x128xf32, #tpu.memory_space<vmem>>, vector<1x16x128xf32>
    %202 = vector.shape_cast %201 : vector<1x16x128xf32> to vector<16x128xf32>
    %203 = arith.mulf %202, %190 : vector<16x128xf32>
    %204 = arith.index_cast %c3_i32 : i32 to index
    %c0_78 = arith.constant 0 : index
    %c0_79 = arith.constant 0 : index
    %205 = vector.load %arg10[%204, %c0_78, %c0_79] : memref<8x16x128xf32, #tpu.memory_space<vmem>>, vector<1x16x128xf32>
    %206 = vector.shape_cast %205 : vector<1x16x128xf32> to vector<16x128xf32>
    %207 = arith.addf %203, %206 : vector<16x128xf32>
    %208 = arith.index_cast %c3_i32 : i32 to index
    %c0_80 = arith.constant 0 : index
    %c0_81 = arith.constant 0 : index
    %209 = vector.load %arg11[%208, %c0_80, %c0_81] : memref<8x16x128xf32, #tpu.memory_space<vmem>>, vector<1x16x128xf32>
    %210 = vector.shape_cast %209 : vector<1x16x128xf32> to vector<16x128xf32>
    %211 = arith.mulf %207, %210 : vector<16x128xf32>
    %cst_82 = arith.constant dense<0.000000e+00> : vector<128xf32>
    %212 = vector.multi_reduction <add>, %211, %cst_82 [0] : vector<16x128xf32> to vector<128xf32>
    %213 = arith.index_cast %c3_i32 : i32 to index
    %c0_83 = arith.constant 0 : index
    %214 = vector.load %arg12[%213, %c0_83] : memref<8x128xf32, #tpu.memory_space<vmem>>, vector<1x128xf32>
    %215 = vector.shape_cast %214 : vector<1x128xf32> to vector<128xf32>
    %216 = vector.shape_cast %212 : vector<128xf32> to vector<1x128xf32>
    tpu.vector_store %arg12[%213, %c0_83], %216 {strides = array<i32>} : memref<8x128xf32, #tpu.memory_space<vmem>>, vector<1x128xf32>,
    %c4_i32 = arith.constant 4 : i32
    %217 = arith.index_cast %c4_i32 : i32 to index
    %c0_84 = arith.constant 0 : index
    %c0_85 = arith.constant 0 : index
    %218 = vector.load %arg9[%217, %c0_84, %c0_85] : memref<8x16x128xf32, #tpu.memory_space<vmem>>, vector<1x16x128xf32>
    %219 = vector.shape_cast %218 : vector<1x16x128xf32> to vector<16x128xf32>
    %220 = arith.mulf %219, %207 : vector<16x128xf32>
    %221 = arith.index_cast %c4_i32 : i32 to index
    %c0_86 = arith.constant 0 : index
    %c0_87 = arith.constant 0 : index
    %222 = vector.load %arg10[%221, %c0_86, %c0_87] : memref<8x16x128xf32, #tpu.memory_space<vmem>>, vector<1x16x128xf32>
    %223 = vector.shape_cast %222 : vector<1x16x128xf32> to vector<16x128xf32>
    %224 = arith.addf %220, %223 : vector<16x128xf32>
    %225 = arith.index_cast %c4_i32 : i32 to index
    %c0_88 = arith.constant 0 : index
    %c0_89 = arith.constant 0 : index
    %226 = vector.load %arg11[%225, %c0_88, %c0_89] : memref<8x16x128xf32, #tpu.memory_space<vmem>>, vector<1x16x128xf32>
    %227 = vector.shape_cast %226 : vector<1x16x128xf32> to vector<16x128xf32>
    %228 = arith.mulf %224, %227 : vector<16x128xf32>
    %cst_90 = arith.constant dense<0.000000e+00> : vector<128xf32>
    %229 = vector.multi_reduction <add>, %228, %cst_90 [0] : vector<16x128xf32> to vector<128xf32>
    %230 = arith.index_cast %c4_i32 : i32 to index
    %c0_91 = arith.constant 0 : index
    %231 = vector.load %arg12[%230, %c0_91] : memref<8x128xf32, #tpu.memory_space<vmem>>, vector<1x128xf32>
    %232 = vector.shape_cast %231 : vector<1x128xf32> to vector<128xf32>
    %233 = vector.shape_cast %229 : vector<128xf32> to vector<1x128xf32>
    tpu.vector_store %arg12[%230, %c0_91], %233 {strides = array<i32>} : memref<8x128xf32, #tpu.memory_space<vmem>>, vector<1x128xf32>,
    %c5_i32 = arith.constant 5 : i32
    %234 = arith.index_cast %c5_i32 : i32 to index
    %c0_92 = arith.constant 0 : index
    %c0_93 = arith.constant 0 : index
    %235 = vector.load %arg9[%234, %c0_92, %c0_93] : memref<8x16x128xf32, #tpu.memory_space<vmem>>, vector<1x16x128xf32>
    %236 = vector.shape_cast %235 : vector<1x16x128xf32> to vector<16x128xf32>
    %237 = arith.mulf %236, %224 : vector<16x128xf32>
    %238 = arith.index_cast %c5_i32 : i32 to index
    %c0_94 = arith.constant 0 : index
    %c0_95 = arith.constant 0 : index
    %239 = vector.load %arg10[%238, %c0_94, %c0_95] : memref<8x16x128xf32, #tpu.memory_space<vmem>>, vector<1x16x128xf32>
    %240 = vector.shape_cast %239 : vector<1x16x128xf32> to vector<16x128xf32>
    %241 = arith.addf %237, %240 : vector<16x128xf32>
    %242 = arith.index_cast %c5_i32 : i32 to index
    %c0_96 = arith.constant 0 : index
    %c0_97 = arith.constant 0 : index
    %243 = vector.load %arg11[%242, %c0_96, %c0_97] : memref<8x16x128xf32, #tpu.memory_space<vmem>>, vector<1x16x128xf32>
    %244 = vector.shape_cast %243 : vector<1x16x128xf32> to vector<16x128xf32>
    %245 = arith.mulf %241, %244 : vector<16x128xf32>
    %cst_98 = arith.constant dense<0.000000e+00> : vector<128xf32>
    %246 = vector.multi_reduction <add>, %245, %cst_98 [0] : vector<16x128xf32> to vector<128xf32>
    %247 = arith.index_cast %c5_i32 : i32 to index
    %c0_99 = arith.constant 0 : index
    %248 = vector.load %arg12[%247, %c0_99] : memref<8x128xf32, #tpu.memory_space<vmem>>, vector<1x128xf32>
    %249 = vector.shape_cast %248 : vector<1x128xf32> to vector<128xf32>
    %250 = vector.shape_cast %246 : vector<128xf32> to vector<1x128xf32>
    tpu.vector_store %arg12[%247, %c0_99], %250 {strides = array<i32>} : memref<8x128xf32, #tpu.memory_space<vmem>>, vector<1x128xf32>,
    %c6_i32 = arith.constant 6 : i32
    %251 = arith.index_cast %c6_i32 : i32 to index
    %c0_100 = arith.constant 0 : index
    %c0_101 = arith.constant 0 : index
    %252 = vector.load %arg9[%251, %c0_100, %c0_101] : memref<8x16x128xf32, #tpu.memory_space<vmem>>, vector<1x16x128xf32>
    %253 = vector.shape_cast %252 : vector<1x16x128xf32> to vector<16x128xf32>
    %254 = arith.mulf %253, %241 : vector<16x128xf32>
    %255 = arith.index_cast %c6_i32 : i32 to index
    %c0_102 = arith.constant 0 : index
    %c0_103 = arith.constant 0 : index
    %256 = vector.load %arg10[%255, %c0_102, %c0_103] : memref<8x16x128xf32, #tpu.memory_space<vmem>>, vector<1x16x128xf32>
    %257 = vector.shape_cast %256 : vector<1x16x128xf32> to vector<16x128xf32>
    %258 = arith.addf %254, %257 : vector<16x128xf32>
    %259 = arith.index_cast %c6_i32 : i32 to index
    %c0_104 = arith.constant 0 : index
    %c0_105 = arith.constant 0 : index
    %260 = vector.load %arg11[%259, %c0_104, %c0_105] : memref<8x16x128xf32, #tpu.memory_space<vmem>>, vector<1x16x128xf32>
    %261 = vector.shape_cast %260 : vector<1x16x128xf32> to vector<16x128xf32>
    %262 = arith.mulf %258, %261 : vector<16x128xf32>
    %cst_106 = arith.constant dense<0.000000e+00> : vector<128xf32>
    %263 = vector.multi_reduction <add>, %262, %cst_106 [0] : vector<16x128xf32> to vector<128xf32>
    %264 = arith.index_cast %c6_i32 : i32 to index
    %c0_107 = arith.constant 0 : index
    %265 = vector.load %arg12[%264, %c0_107] : memref<8x128xf32, #tpu.memory_space<vmem>>, vector<1x128xf32>
    %266 = vector.shape_cast %265 : vector<1x128xf32> to vector<128xf32>
    %267 = vector.shape_cast %263 : vector<128xf32> to vector<1x128xf32>
    tpu.vector_store %arg12[%264, %c0_107], %267 {strides = array<i32>} : memref<8x128xf32, #tpu.memory_space<vmem>>, vector<1x128xf32>,
    %c7_i32 = arith.constant 7 : i32
    %268 = arith.index_cast %c7_i32 : i32 to index
    %c0_108 = arith.constant 0 : index
    %c0_109 = arith.constant 0 : index
    %269 = vector.load %arg9[%268, %c0_108, %c0_109] : memref<8x16x128xf32, #tpu.memory_space<vmem>>, vector<1x16x128xf32>
    %270 = vector.shape_cast %269 : vector<1x16x128xf32> to vector<16x128xf32>
    %271 = arith.mulf %270, %258 : vector<16x128xf32>
    %272 = arith.index_cast %c7_i32 : i32 to index
    %c0_110 = arith.constant 0 : index
    %c0_111 = arith.constant 0 : index
    %273 = vector.load %arg10[%272, %c0_110, %c0_111] : memref<8x16x128xf32, #tpu.memory_space<vmem>>, vector<1x16x128xf32>
    %274 = vector.shape_cast %273 : vector<1x16x128xf32> to vector<16x128xf32>
    %275 = arith.addf %271, %274 : vector<16x128xf32>
    %276 = arith.index_cast %c7_i32 : i32 to index
    %c0_112 = arith.constant 0 : index
    %c0_113 = arith.constant 0 : index
    %277 = vector.load %arg11[%276, %c0_112, %c0_113] : memref<8x16x128xf32, #tpu.memory_space<vmem>>, vector<1x16x128xf32>
    %278 = vector.shape_cast %277 : vector<1x16x128xf32> to vector<16x128xf32>
    %279 = arith.mulf %275, %278 : vector<16x128xf32>
    %cst_114 = arith.constant dense<0.000000e+00> : vector<128xf32>
    %280 = vector.multi_reduction <add>, %279, %cst_114 [0] : vector<16x128xf32> to vector<128xf32>
    %281 = arith.index_cast %c7_i32 : i32 to index
    %c0_115 = arith.constant 0 : index
    %282 = vector.load %arg12[%281, %c0_115] : memref<8x128xf32, #tpu.memory_space<vmem>>, vector<1x128xf32>
    %283 = vector.shape_cast %282 : vector<1x128xf32> to vector<128xf32>
    %284 = vector.shape_cast %280 : vector<128xf32> to vector<1x128xf32>
    tpu.vector_store %arg12[%281, %c0_115], %284 {strides = array<i32>} : memref<8x128xf32, #tpu.memory_space<vmem>>, vector<1x128xf32>,
    %c8_i32 = arith.constant 8 : i32
    %c0_116 = arith.constant 0 : index
    %c0_117 = arith.constant 0 : index
    %285 = vector.load %arg8[%c0_116, %c0_117] : memref<16x128xf32, #tpu.memory_space<vmem>>, vector<16x128xf32>
    tpu.vector_store %arg8[%c0_116, %c0_117], %275 {strides = array<i32>} : memref<16x128xf32, #tpu.memory_space<vmem>>, vector<16x128xf32>,
    %c0_118 = arith.constant 0 : index
    %c0_119 = arith.constant 0 : index
    %286 = vector.load %arg12[%c0_118, %c0_119] : memref<8x128xf32, #tpu.memory_space<vmem>>, vector<8x128xf32>
    %287 = vector.broadcast %6 : vector<1x128xf32> to vector<8x128xf32>
    %288 = arith.mulf %287, %78 : vector<8x128xf32>
    %289 = arith.addf %286, %288 : vector<8x128xf32>
    %c64_i32 = arith.constant 64 : i32
    %290 = tpu.dynamic_rotate %289 by %c64_i32 dim 1 : vector<8x128xf32>, i32 -> vector<8x128xf32>
    %291 = arith.addf %289, %290 : vector<8x128xf32>
    %292 = arith.mulf %291, %63 : vector<8x128xf32>
    %293 = arith.addf %292, %0 : vector<8x128xf32>
    %c0_120 = arith.constant 0 : index
    %c0_121 = arith.constant 0 : index
    %294 = vector.load %arg7[%c0_120, %c0_121] : memref<8x128xf32, #tpu.memory_space<vmem>>, vector<8x128xf32>
    tpu.vector_store %arg7[%c0_120, %c0_121], %293 {strides = array<i32>} : memref<8x128xf32, #tpu.memory_space<vmem>>, vector<8x128xf32>,
    return
  }
  func.func @transform_0(%arg0: i32) -> (i32, i32) {
    %c0_i32 = arith.constant 0 : i32
    %c0_i32_0 = arith.constant 0 : i32
    return %arg0, %c0_i32 : i32, i32
  }
  func.func @transform_1(%arg0: i32) -> (i32, i32) {
    %c0_i32 = arith.constant 0 : i32
    %c0_i32_0 = arith.constant 0 : i32
    %c0_i32_1 = arith.constant 0 : i32
    return %c0_i32, %c0_i32_0 : i32, i32
  }
  func.func @transform_2(%arg0: i32) -> (i32, i32) {
    %c0_i32 = arith.constant 0 : i32
    %c0_i32_0 = arith.constant 0 : i32
    %c0_i32_1 = arith.constant 0 : i32
    return %c0_i32, %c0_i32_0 : i32, i32
  }
  func.func @transform_3(%arg0: i32) -> (i32, i32) {
    %c0_i32 = arith.constant 0 : i32
    %c0_i32_0 = arith.constant 0 : i32
    %c0_i32_1 = arith.constant 0 : i32
    return %c0_i32, %c0_i32_0 : i32, i32
  }
  func.func @transform_4(%arg0: i32) -> (i32, i32) {
    %c0_i32 = arith.constant 0 : i32
    %c0_i32_0 = arith.constant 0 : i32
    %c0_i32_1 = arith.constant 0 : i32
    return %c0_i32, %c0_i32_0 : i32, i32
  }
  func.func @transform_5(%arg0: i32) -> (i32, i32) {
    %c0_i32 = arith.constant 0 : i32
    %c0_i32_0 = arith.constant 0 : i32
    %c0_i32_1 = arith.constant 0 : i32
    return %c0_i32, %c0_i32_0 : i32, i32
  }
  func.func @transform_6(%arg0: i32) -> (i32, i32) {
    %c0_i32 = arith.constant 0 : i32
    %c0_i32_0 = arith.constant 0 : i32
    return %arg0, %c0_i32 : i32, i32
  }
}

</mosaic_0001>

<bundles_post_ra>
// kernel: tpu_custom_call.1
= control target key start
LH: loop header
LB: loop body
LE: loop exit
PB: predicated region body
PF: predicated region fallthrough
CT: control target
= control target key end

     0   :  { %11 = vsyncpa [#allocation8], 0  ;;  %s3526_s0 = inlined_call_operand.hbm [shape: f32[16,128], index: 0, kind: input, shape index: {}]   ;;  %s3527_s1 = inlined_call_operand.hbm [shape: bf16[64,128], index: 1, kind: input, shape index: {}]   ;;  %s3528_s2 = inlined_call_operand.hbm [shape: bf16[64,128], index: 2, kind: input, shape index: {}]   ;;  %s3529_s3 = inlined_call_operand.hbm [shape: bf16[128,128], index: 3, kind: input, shape index: {}]   ;;  %s3530_s4 = inlined_call_operand.hbm [shape: bf16[128,128], index: 4, kind: input, shape index: {}]   ;;  %s3531_s5 = inlined_call_operand.hbm [shape: f32[24,128], index: 5, kind: input, shape index: {}]   ;;  %s3532_s6 = inlined_call_operand.hbm [shape: f32[16,128], index: 6, kind: output, shape index: {}]  }
   0x1   :  { %13 = vsyncpa [#allocation8 + $0x1], 0 }
   0x2   :  { %14 = vsyncpa [#allocation11], 0 }
   0x3   :  { %15 = vsyncpa [#allocation14], 0 }
   0x4   :  { %16 = vsyncpa [#allocation17], 0 }
   0x5   :  { %17 = vsyncpa [#allocation9], 0 }
   0x6   :  { %19 = vsyncpa [#allocation9 + $0x1], 0  ;;  %s2787_s21 = smov 0   ;;  %s2789_s22 = smov 0  }
   0x7   :  { %s2791_s23 = smov 0   ;;  %s2793_s24 = smov 0  }
   0x8 LB: > { %s198_s27 = sshll.u32 %s3527_s1, 4  ;;  %s2811_s28 = sadd.s32 4294967295, %s2737_s24   ;;  %s2737_s24 = sphi %s2793_s24, %s3544_s24   ;;  %s2733_s23 = sphi %s2791_s23, %s3543_s23   ;;  %s2729_s22 = sphi %s2789_s22, %s3542_s22   ;;  %s2725_s21 = sphi %s2787_s21, %s3541_s21   ;;  %s199_s27 = int_to_ptr.hbm [resolvable:$true] %s198_s27 }
   0x9   : > { %p2090_p0 = scmp.ge.s32.totalorder %s2737_s24, 1  ;;  %p46_p1 = scmp.eq.s32.totalorder %s2811_s28, 0 }
   0xa   : > { %p187_p2 = scmp.lt.s32.totalorder %s2737_s24, 3  ;;  %s2739_s30 = smov [#allocation10]  }
   0xb   : > { %s200_s7 = sshll.u32 %s2739_s30, 4  ;;  %s226_s10 = sshll.u32 %s3529_s3, 4  ;;  %s201_s7 = int_to_ptr.vmem [resolvable:$true] %s200_s7  ;;  %s227_s10 = int_to_ptr.hbm [resolvable:$true] %s226_s10 }
   0xc   : > { %p2817_p4 = pnand %p2090_p0, %p187_p2  ;;  %s212_s14 = sshll.u32 %s3528_s2, 4  ;;  %s213_s14 = int_to_ptr.hbm [resolvable:$true] %s212_s14 }
   0xd   : > { %s2740_s15 = smov [#allocation13]   ;;  %s2741_s17 = smov 64  }
   0xe   : > { %p2258_p5 = pneg %p2817_p4  ;;  %s228_s16 = sshll.u32 %s2740_s15, 4  ;;  %s229_s16 = int_to_ptr.vmem [resolvable:$true] %s228_s16 }
   0xf   : > { %s2742_s18 = smov 4   ;;  %s240_s25 = sshll.u32 %s3530_s4, 4  ;;  %s241_s25 = int_to_ptr.hbm [resolvable:$true] %s240_s25 }
  0x10   : > { %p2829_p7 = pnand %p2258_p5, %p46_p1  ;;  %s2743_s26 = smov [#allocation12]  }
  0x11   : > { %s214_s30 = sshll.u32 %s2743_s26, 4  ;;  %s2745_s12 = smov [#allocation16]   ;;  %s215_s30 = int_to_ptr.vmem [resolvable:$true] %s214_s30 }
  0x12   : > { %2261 = dma.hbm_to_vmem [thread:$0]  (!%p2829_p7), %s199_s27, 512, %s201_s7, [#allocation11], %s2741_s17, %s2741_s17, %s2742_s18  }
  0x13   : > { %2267 = dma.hbm_to_vmem [thread:$0]  (!%p2829_p7), %s227_s10, 1024, %s229_s16, [#allocation14], %s2741_s17, %s2741_s17, %s2742_s18  }
  0x14   : > { %2264 = dma.hbm_to_vmem [thread:$0]  (!%p2829_p7), %s213_s14, 512, %s215_s30, [#allocation11], %s2741_s17, %s2741_s17, %s2742_s18  }
  0x15   : > { %s2744_s27 = smov [#allocation15]   ;;  %s254_s10 = sshll.u32 %s3531_s5, 4  ;;  %s255_s10 = int_to_ptr.hbm [resolvable:$true] %s254_s10 }
  0x16   : > { %s242_s7 = sshll.u32 %s2744_s27, 4  ;;  %s256_s13 = sshll.u32 %s2745_s12, 4  ;;  %s243_s7 = int_to_ptr.vmem [resolvable:$true] %s242_s7  ;;  %s257_s13 = int_to_ptr.vmem [resolvable:$true] %s256_s13 }
  0x17   : > { %2270 = dma.hbm_to_vmem [thread:$0]  (!%p2829_p7), %s241_s25, 1024, %s243_s7, [#allocation14], %s2741_s17, %s2741_s17, %s2742_s18  }
  0x18   : > { %s2746_s14 = smov 128   ;;  %s2747_s15 = smov 8  }
  0x19   : > { %2273 = dma.hbm_to_vmem [thread:$0]  (!%p2829_p7), %s255_s10, 384, %s257_s13, [#allocation17], %s2746_s14, %s2746_s14, %s2747_s15  }
  0x1a   : > { %s2089_s16 = sadd.s32 4294967294, %s2737_s24   ;;  %s2854_s19 = sadd.s32 1, %s2737_s24  }
  0x1b   : > { %s32_s20 = sadd.s32 1, %s2733_s23  ;;  %s29_s26 = ssub.s32 %s2737_s24, %s2854_s19 }
  0x1c   : > { %p39_p8 = scmp.ne.s32.totalorder %s2733_s23, %s2729_s22  ;;  %p30_p9 = scmp.eq.s32.totalorder %s29_s26, 0 }
  0x1d   : > { %p40_p10 = scmp.eq.s32.totalorder %s2737_s24, 0  ;;  %p45_p11 = scmp.ne.s32.totalorder %s2729_s22, %s2725_s21 }
  0x1e   : > { %p174_p12 = scmp.eq.s32.totalorder %s2811_s28, 1  ;;  %p180_p2 = scmp.eq.s32.totalorder %s2089_s16, 1 }
  0x1f   : > { %s2866_s17 = scalar_select %p30_p9, %s2733_s23, %s32_s20  }
  0x20   : > { %p2870_p13 = por %p46_p1, %p45_p11  ;;  %p2874_p0 = por %p174_p12, %p39_p8 }
  0x21   : > { %p41_p5 = por %p40_p10, %p39_p8  ;;  %s270_s25 = sand.u32 1, %s2733_s23  }
  0x22   : > { %p2879_p7 = por %p180_p2, %p45_p11  ;;  %p2287_p6 = scmp.lt.s32.totalorder %s2737_s24, 2 }
  0x23   : > { %s2097_s27 = sshll.u32 %s270_s25, 3  ;;  %s2098_s7 = sshll.u32 %s2737_s24, 3 }
  0x24   : > { %s278_s10 = scalar_lea.hbm %s3526_s0, %s2098_s7  ;;  %s274_s13 = scalar_lea.vmem [#allocation7], %s2097_s27 }
  0x25   : > { %s280_s12 = sshll.u32 %s278_s10, 4  ;;  %s282_s14 = sshll.u32 %s274_s13, 4  ;;  %s281_s12 = int_to_ptr.hbm [resolvable:$true] %s280_s12  ;;  %s283_s14 = int_to_ptr.vmem [resolvable:$true] %s282_s14 }
  0x26   : > { %p2888_p9 = pnand %p2287_p6, %p41_p5  ;;  %s271_s16 = scalar_lea.sflag [#allocation8], %s270_s25 }
  0x27   : > { %s2629_s20 = sshra.s32 %s281_s12, 4  ;;  %s2636_s27 = scalar_lea.hbm %s3526_s0, 16  ;;  %s2630_s20 = int_to_ptr.hbm [resolvable:$true] %s2629_s20 }
  0x28   : > { %s2631_s26 = scalar_lea.hbm %s2630_s20, 8  ;;  %p2633_p10 = pneg %p2888_p9 }
  0x29   : > { %p2632_p8 = scmp.ne.s32.totalorder %s2630_s20, %s2631_s26  ;;  %p2637_p6 = scmp.lt.s32.totalorder %s2630_s20, %s3526_s0 }
  0x2a   : > { %p2638_p2 = scmp.lt.s32.totalorder %s2636_s27, %s2631_s26 }
  0x2b   : > { %p2634_p11 = pnand %p2633_p10, %p2632_p8 }
  0x2c   : > { %p2639_p5 = por %p2638_p2, %p2637_p6 }
  0x2d   : > { %p2635_p12 = pneg %p2634_p11 }
  0x2f   : > { %p2640_p3 = pnand %p2639_p5, %p2635_p12 }
  0x31   : > { %2643 = shalt.err (!%p2640_p3)
}
  0x32   : > { %2277 = dma.hbm_to_vmem [thread:$0]  (!%p2888_p9), %s281_s12, 128, %s283_s14, %s271_s16  }
  0x33   : > { %291 = sbr.rel (%p2817_p4) target bundleno = 1877 (0x755), region = 44  ;;  %s2905_s25 = sand.u32 (!%p2817_p4), 1, %s2729_s22  }
  0x34   : > { %s2100_s13 = sshll.u32 (!%p2817_p4), %s2905_s25, 3  ;;  %s294_s7 = scalar_lea.sflag (!%p2817_p4), [#allocation8], %s2905_s25 }
  0x35   : > { %s297_s20 = scalar_lea.vmem (!%p2817_p4), [#allocation7], %s2100_s13 }
  0x38   : > { %2704 = dma.done.wait (%p2870_p13), %s294_s7, 128  }
  0x39   : > { %2706 = vsyncadd (%p2870_p13), %s294_s7, 4294967168 }
  0x3a   : > { %2708 = dma.done.wait (%p46_p1), [#allocation11], 1024  }
  0x3b   : > { %2710 = vsyncadd (%p46_p1), [#allocation11], 4294966272 }
  0x3c   : > { %2712 = dma.done.wait (%p46_p1), [#allocation14], 2048  }
  0x3d   : > { %2714 = vsyncadd (%p46_p1), [#allocation14], 4294965248 }
  0x3e   : > { %2716 = dma.done.wait (%p46_p1), [#allocation17], 384  }
  0x3f   : > { %2718 = vsyncadd (%p46_p1), [#allocation17], 4294966912  ;;  %vm362_vm0 = vcmask 261120   ;;  %v2927_v0 = vld [vmem:[#allocation16 + $0x5] sm:$0x1]  ;;  %v2929_v1 = vld [vmem:[%s297_s20] sm:$0xff] }
  0x40   : > { %s2748_s29 = smov 96   ;;  %v363_v2 = vsel %vm362_vm0, %v2929_v1, 0.0  ;;  %v2749_v3 = vmov 32.0   ;;  %v2213_v25 = vld [vmem:[#allocation10 + $0x18] sm:$0xff]  ;;  %v2212_v27 = vld [vmem:[#allocation10 + $0x10] sm:$0xff]  ;;  %v2211_v28 = vld [vmem:[#allocation10 + $0x8] sm:$0xff] }
  0x41   : > { %393 = vrot.lane.b32.xlu1 %v2929_v1, %s2748_s29  ;;  %364 = vadd.xlane.f32.xlu0 %v363_v2  ;;  %2429 = vrcp.f32 %v2749_v3  ;;  %v2210_v29 = vld [vmem:[#allocation10] sm:$0xff]  ;;  %v2217_v33 = vld [vmem:[#allocation12 + $0x18] sm:$0xff]  ;;  %v2216_v35 = vld [vmem:[#allocation12 + $0x10] sm:$0xff]  ;;  %vm461_vm8 = vcmask 523264   ;;  %vm1241_vm15 = vcmask 785408   ;;  %s3483_s11 = scalar_lea.vmem [#allocation18], %s2100_s13 }
  0x42   : > { %469 = vmatpush.bf16.msra.mxu0 %v2213_v25  ;;  %539 = vmatpush.bf16.msra.mxu1 %v2217_v33  ;;  %v2215_v38 = vld [vmem:[#allocation12 + $0x8] sm:$0xff]  ;;  %v2424_v50 = vld [vmem:[#allocation16] ss:$0 sm:$0xff]  ;;  %v2425_v53 = vld [vmem:[#allocation16 + $0x1] ss:$0 sm:$0xff]  ;;  %v818_v33 = vlaneseq  ;;  %p3539_p1 = scmp.ne.s32.totalorder %s2811_s28, 0 }
  0x43   : > { %v2214_v58 = vld [vmem:[#allocation12] sm:$0xff]  ;;  %v2225_v62 = vld [vmem:[#allocation13 + $0x38] sm:$0xff] }
  0x44   : > { %v2426_v59 = vld [vmem:[#allocation16 + $0x2] ss:$0 sm:$0xff]  ;;  %v2233_v63 = vld [vmem:[#allocation15 + $0x38] sm:$0xff]  ;;  %622 = vmatpush.bf16.msra.mxu2 %v2225_v62 }
  0x45   : > { %707 = vmatpush.bf16.msra.mxu3 %v2233_v63  ;;  %v2221_v25 = vld [vmem:[#allocation13 + $0x18] sm:$0xff] }
  0x46   : > { %470 = vmatpush.bf16.msra.mxu0 %v2212_v27  ;;  %540 = vmatpush.bf16.msra.mxu1 %v2216_v35  ;;  %v2220_v27 = vld [vmem:[#allocation13 + $0x10] sm:$0xff]  ;;  %v2944_v35 = vshrl.u32 %v818_v33, 7 }
  0x47   : > { %v2430_v4 = vpop.eup %2429 }
  0x48   : > { %v367_v5 = vmul.f32 32.0, %v2430_v4  ;;  %vm371_vm1 = vweird.f32 %v2430_v4  ;;  %2341 = vset.pattern.permute.xlu1 %v2944_v35  ;;  %2339 = vset.pattern.permute.xlu0 %v2944_v35 }
  0x4a   : > { %v368_v6 = vsub.f32 1.0, %v367_v5  ;;  %471 = vmatpush.bf16.msra.mxu0 %v2211_v28  ;;  %541 = vmatpush.bf16.msra.mxu1 %v2215_v38  ;;  %v2228_v28 = vld [vmem:[#allocation15 + $0x10] sm:$0xff] }
  0x4c   : > { %v369_v7 = vmul.f32 %v2430_v4, %v368_v6 }
  0x4e   : > { %v370_v8 = vadd.f32 %v2430_v4, %v369_v7  ;;  %472 = vmatpush.bf16.msra.mxu0 %v2210_v29  ;;  %542 = vmatpush.bf16.msra.mxu1 %v2214_v58  ;;  %v2219_v29 = vld [vmem:[#allocation13 + $0x8] sm:$0xff] }
  0x50   : > { %v372_v10 = vsel %vm371_vm1, %v2430_v4, %v370_v8 }
  0xb3   : > { %v394_v9 = vpop.permute.xlu1 %393 }
  0xb4   : > { %v396_v11 = vsel %vm362_vm0, %v394_v9, 0.0  ;;  %v365_v12 = vpop.xlane.xlu0 %364 }
  0xb5   : > { %397 = vadd.xlane.f32.xlu1 %v396_v11  ;;  %v373_v13 = vmul.f32 %v372_v10, %v365_v12 }
  0xb7   : > { %v374_v14 = vsub.f32 %v2929_v1, %v373_v13 }
  0xb9   : > { %v375_v15 = vmul.f32 %v374_v14, %v374_v14 }
  0xbb   : > { %v376_v16 = vsel %vm362_vm0, %v375_v15, 0.0 }
  0xbc   : > { %377 = vadd.xlane.f32.xlu0 %v376_v16 }
 0x128   : > { %v398_v17 = vpop.xlane.xlu1 %397 }
 0x129   : > { %v399_v18 = vmul.f32 %v398_v17, %v372_v10 }
 0x12b   : > { %v400_v19 = vsub.f32 %v2929_v1, %v399_v18 }
 0x12d   : > { %v401_v20 = vmul.f32 %v400_v19, %v400_v19 }
 0x12f   : > { %403 = vrot.lane.b32.xlu2 %v401_v20, %s2748_s29  ;;  %v378_v23 = vpop.xlane.xlu0 %377  ;;  %v2232_v20 = vld [vmem:[#allocation15 + $0x30] sm:$0xff] }
 0x130   : > { %v379_v24 = vmul.f32 %v378_v23, %v372_v10  ;;  %708 = vmatpush.bf16.msra.mxu3 %v2232_v20  ;;  %v2222_v23 = vld [vmem:[#allocation13 + $0x20] sm:$0xff] }
 0x132   : > { %v380_v26 = vadd.f32 1e-05, %v379_v24  ;;  %v2230_v24 = vld [vmem:[#allocation15 + $0x20] sm:$0xff] }
 0x134   : > { %2431 = vrsqrt.f32 %v380_v26  ;;  %vm387_vm2 = vweird.f32 %v380_v26 }
 0x13a   : > { %v2432_v30 = vpop.eup %2431 }
 0x13b   : > { %v382_v31 = vmul.f32 %v2432_v30, %v380_v26  ;;  %vm388_vm3 = vweird.f32 %v2432_v30  ;;  %v2229_v26 = vld [vmem:[#allocation15 + $0x18] sm:$0xff] }
 0x13c   : > { %vm389_vm4 = vmor %vm387_vm2, %vm388_vm3 }
 0x13d   : > { %v383_v37 = vmul.f32 %v2432_v30, %v382_v31  ;;  %v2218_v31 = vld [vmem:[#allocation13] sm:$0xff] }
 0x13f   : > { %v384_v39 = vmul.f32 0.5, %v383_v37  ;;  %v2949_v37 = vadd.s32 8, %v2944_v35 }
 0x141   : > { %v385_v41 = vsub.f32 1.5, %v384_v39  ;;  %2340 = vset.pattern.permute.xlu2 %v2949_v37 }
 0x143   : > { %v386_v44 = vmul.f32 %v2432_v30, %v385_v41 }
 0x145   : > { %v390_v47 = vsel %vm389_vm4, %v2432_v30, %v386_v44  ;;  %v2227_v30 = vld [vmem:[#allocation15 + $0x8] sm:$0xff] }
 0x146   : > { %v391_v51 = vmul.f32 %v390_v47, %v374_v14 }
 0x189   : > { %v404_v21 = vpop.permute.xlu2 %403 }
 0x18a   : > { %v406_v22 = vsel %vm362_vm0, %v404_v21, 0.0  ;;  %v2223_v21 = vld [vmem:[#allocation13 + $0x28] sm:$0xff] }
 0x18b   : > { %407 = vadd.xlane.f32.xlu2 %v406_v22  ;;  %v2231_v22 = vld [vmem:[#allocation15 + $0x28] sm:$0xff] }
 0x18c   : > { %709 = vmatpush.bf16.msra.mxu3 %v2231_v22 }
 0x190   : > { %710 = vmatpush.bf16.msra.mxu3 %v2230_v24 }
 0x194   : > { %711 = vmatpush.bf16.msra.mxu3 %v2229_v26 }
 0x198   : > { %712 = vmatpush.bf16.msra.mxu3 %v2228_v28 }
 0x19c   : > { %713 = vmatpush.bf16.msra.mxu3 %v2227_v30 }
 0x1fe   : > { %v408_v32 = vpop.xlane.xlu2 %407 }
 0x1ff   : > { %v409_v34 = vmul.f32 %v408_v32, %v372_v10  ;;  %v2226_v32 = vld [vmem:[#allocation15] sm:$0xff] }
 0x200   : > { %714 = vmatpush.bf16.msra.mxu3 %v2226_v32 }
 0x201   : > { %v410_v36 = vadd.f32 1e-05, %v409_v34  ;;  %v2427_v34 = vld [vmem:[#allocation16 + $0x3] ss:$0 sm:$0xff] }
 0x203   : > { %2433 = vrsqrt.f32 %v410_v36  ;;  %vm417_vm6 = vweird.f32 %v410_v36 }
 0x209   : > { %v2434_v40 = vpop.eup %2433 }
 0x20a   : > { %v412_v42 = vmul.f32 %v2434_v40, %v410_v36  ;;  %vm418_vm5 = vweird.f32 %v2434_v40 }
 0x20b   : > { %vm419_vm7 = vmor %vm417_vm6, %vm418_vm5 }
 0x20c   : > { %v413_v43 = vmul.f32 %v2434_v40, %v412_v42 }
 0x20e   : > { %v414_v45 = vmul.f32 0.5, %v413_v43 }
 0x210   : > { %v415_v46 = vsub.f32 1.5, %v414_v45 }
 0x212   : > { %v416_v48 = vmul.f32 %v2434_v40, %v415_v46 }
 0x214   : > { %v420_v49 = vsel %vm419_vm7, %v2434_v40, %v416_v48  ;;  %v2428_v48 = vld [vmem:[#allocation16 + $0x4] ss:$0 sm:$0xff] }
 0x215   : > { %v421_v52 = vmul.f32 %v420_v49, %v400_v19  ;;  %v2224_v19 = vld [vmem:[#allocation13 + $0x30] sm:$0xff] }
 0x216   : > { %623 = vmatpush.bf16.msra.mxu2 %v2224_v19 }
 0x217   : > { %v422_v54 = vsel %vm362_vm0, %v391_v51, %v421_v52 }
 0x218   : > { %v424_v55 = vmul.f32 %v2424_v50, %v422_v54 }
 0x21a   : > { %v426_v56 = vadd.f32 %v2425_v53, %v424_v55  ;;  %624 = vmatpush.bf16.msra.mxu2 %v2223_v21 }
 0x21c   : > { %v435_v57 = vpack.c.bf16 %v426_v56, %v426_v56 }
 0x21e   : > { %2123 = vmatmul.msk.bf16.vlgmr.msra.gmra.mxu0 %vm461_vm8, %v435_v57  ;;  %625 = vmatpush.bf16.msra.mxu2 %v2222_v23 }
 0x222   : > { %626 = vmatpush.bf16.msra.mxu2 %v2221_v25 }
 0x226   : > { %627 = vmatpush.bf16.msra.mxu2 %v2220_v27 }
 0x22a   : > { %628 = vmatpush.bf16.msra.mxu2 %v2219_v29 }
 0x22e   : > { %629 = vmatpush.bf16.msra.mxu2 %v2218_v31 }
 0x29b   : > { %v474_v60 = vpop.f32.mrf.mxu0 }
 0x29c   : > { %v475_v61 = vadd.f32 %v2426_v59, %v474_v60 }
 0x29e   : > { %v478_v2 = vsub.f32 0.0, %v475_v61  ;;  %v506_v3 = vpack.c.bf16 %v475_v61, %v475_v61 }
 0x2a0   : > { %v479_v4 = vmul.f32 1.442695, %v478_v2  ;;  %2140 = vmatmul.msk.bf16.vlgmr.msra.gmra.mxu1 %vm461_vm8, %v506_v3 }
 0x2a2   : > { %2435 = vpow2.f32 %v479_v4 }
 0x2a3   : > { %v476_v5 = vpop.f32.mrf.mxu0 }
 0x2a8   : > { %v2436_v6 = vpop.eup %2435 }
 0x2a9   : > { %v481_v7 = vadd.f32 1.0, %v2436_v6 }
 0x2ab   : > { %2437 = vrcp.f32 %v481_v7  ;;  %v493_v11 = vand.u32 2147483648, %v481_v7  ;;  %v491_v13 = vand.u32 2147483647, %v481_v7  ;;  %vm487_vm10 = vweird.f32 %v481_v7 }
 0x2ad   : > { %v494_v15 = vor.u32 1.1754944e-38, %v493_v11  ;;  %vm492_vm12 = vcmp.eq.f32.partialorder %v491_v13, 8.507059e+37 }
 0x2b1   : > { %v2438_v8 = vpop.eup %2437 }
 0x2b2   : > { %v483_v9 = vmul.f32 %v2438_v8, %v481_v7  ;;  %vm488_vm9 = vweird.f32 %v2438_v8  ;;  %v360_v7 = vld [vmem:[#allocation16 + $0x8] sm:$0xff] }
 0x2b3   : > { %vm489_vm11 = vmor %vm487_vm10, %vm488_vm9 }
 0x2b4   : > { %v484_v10 = vsub.f32 1.0, %v483_v9 }
 0x2b6   : > { %v485_v12 = vmul.f32 %v2438_v8, %v484_v10 }
 0x2b8   : > { %v486_v14 = vadd.f32 %v2438_v8, %v485_v12 }
 0x2ba   : > { %v490_v16 = vsel %vm489_vm11, %v2438_v8, %v486_v14  ;;  %v361_v8 = vld [vmem:[#allocation16 + $0x10] sm:$0xff] }
 0x2bb   : > { %v495_v17 = vsel %vm492_vm12, %v494_v15, %v490_v16 }
 0x2bc   : > { %v2942_v18 = vmul.f32 %v495_v17, %v475_v61 }
 0x31d   : > { %v544_v36 = vpop.f32.mrf.mxu1 }
 0x31e   : > { %v545_v38 = vadd.f32 %v2427_v34, %v544_v36 }
 0x320   : > { %v549_v39 = vmin.f32 %v545_v38, 20.0  ;;  %vm548_vm13 = vcmp.gt.f32.partialorder %v545_v38, 20.0 }
 0x322   : > { %v550_v40 = vmul.f32 1.442695, %v549_v39 }
 0x324   : > { %2439 = vpow2.f32 %v550_v40 }
 0x325   : > { %v546_v41 = vpop.f32.mrf.mxu1 }
 0x32a   : > { %v2440_v42 = vpop.eup %2439 }
 0x32b   : > { %v552_v43 = vadd.f32 1.0, %v2440_v42 }
 0x32d   : > { %2441 = vlog2.f32 %v552_v43 }
 0x333   : > { %v2442_v44 = vpop.eup %2441 }
 0x334   : > { %v554_v45 = vmul.f32 0.6931472, %v2442_v44 }
 0x336   : > { %v2952_v46 = vsel %vm548_vm13, %v545_v38, %v554_v45 }
 0x337   : > { %v572_v47 = vpack.c.bf16 %v2952_v46, %v2952_v46 }
 0x339   : > { %630 = vmatmul.bf16.vlgmr.msra.gmra.mxu2 %v572_v47  ;;  %715 = vmatmul.bf16.vlgmr.msra.gmra.mxu3 %v572_v47 }
 0x3bc   : > { %v631_v49 = vpop.f32.mrf.mxu2  ;;  %v2956_v50 = vpop.f32.mrf.mxu3 }
 0x3bd   : > { %v632_v51 = vadd.f32 %v2428_v48, %v631_v49  ;;  %v2959_v52 = vperm.slane %v2956_v50, 0  ;;  %v2962_v53 = vperm.slane %v2956_v50, 1  ;;  %v2968_v58 = vperm.slane %v2956_v50, 2 }
 0x3be   : > { %v2971_v59 = vperm.slane %v2956_v50, 3  ;;  %v2977_v62 = vperm.slane %v2956_v50, 4  ;;  %v2996_v26 = vperm.slane %v2956_v50, 5 }
 0x3bf   : > { %v636_v54 = vmin.f32 %v632_v51, 20.0  ;;  %835 = vperm.xlu1 %2341, %v2962_v53   ;;  %828 = vperm.xlu2 %2340, %v2959_v52   ;;  %vm635_vm14 = vcmp.gt.f32.partialorder %v632_v51, 20.0 }
 0x3c0   : > { %822 = vperm.xlu0 %2339, %v2959_v52  }
 0x3c1   : > { %v637_v55 = vmul.f32 1.442695, %v636_v54 }
 0x3c3   : > { %2443 = vpow2.f32 %v637_v55 }
 0x3c4   : > { %v633_v56 = vpop.f32.mrf.mxu2  ;;  %v718_v57 = vpop.f32.mrf.mxu3 }
 0x3c7   : > { %861 = vperm.xlu1 %2341, %v2971_v59   ;;  %854 = vperm.xlu2 %2340, %v2968_v58  }
 0x3c8   : > { %2342 = vset.pattern.permute.xlu0 %v2949_v37 }
 0x3c9   : > { %v2444_v60 = vpop.eup %2443 }
 0x3ca   : > { %v639_v61 = vadd.f32 1.0, %v2444_v60 }
 0x3cc   : > { %2445 = vlog2.f32 %v639_v61 }
 0x3cf   : > { %874 = vperm.xlu1 %2341, %v2977_v62   ;;  %867 = vperm.xlu2 %2340, %v2971_v59  }
 0x3d0   : > { %841 = vperm.xlu0 %2342, %v2962_v53  }
 0x3d2   : > { %v2446_v63 = vpop.eup %2445 }
 0x3d3   : > { %v641_v2 = vmul.f32 0.6931472, %v2446_v63 }
 0x3d5   : > { %v2982_v3 = vsel %vm635_vm14, %v632_v51, %v641_v2  ;;  %v3002_v51 = vperm.slane %v2956_v50, 6 }
 0x3d6   : > { %v722_v4 = vrot.slane %v2982_v3, 1  ;;  %v723_v5 = vrot.slane %v2982_v3, 2  ;;  %v724_v6 = vrot.slane %v2982_v3, 3  ;;  %v725_v9 = vrot.slane %v2982_v3, 4 }
 0x3d7   : > { %2346 = vset.pattern.permute.xlu1 %v2949_v37  ;;  %2345 = vset.pattern.permute.xlu2 %v2944_v35  ;;  %v729_v10 = vperm.slane %v2982_v3, 0  ;;  %v726_v13 = vrot.slane %v2982_v3, 5  ;;  %v727_v20 = vrot.slane %v2982_v3, 6  ;;  %v728_v23 = vrot.slane %v2982_v3, 7 }
 0x3d8   : > { %v730_v11 = vperm.slane %v722_v4, 0  ;;  %v731_v12 = vperm.slane %v723_v5, 0  ;;  %2343 = vset.pattern.permute.xlu0 %v2944_v35  ;;  %v732_v14 = vperm.slane %v724_v6, 0  ;;  %v733_v21 = vperm.slane %v725_v9, 0 }
 0x3d9   : > { %v745_v15 = vmul.f32 %v729_v10, %v360_v7  ;;  %v746_v16 = vmul.f32 %v729_v10, %v361_v8  ;;  %v734_v24 = vperm.slane %v726_v13, 0  ;;  %v735_v33 = vperm.slane %v727_v20, 0 }
 0x3da   : > { %v747_v17 = vmul.f32 %v730_v11, %v360_v7  ;;  %v748_v19 = vmul.f32 %v730_v11, %v361_v8  ;;  %v749_v22 = vmul.f32 %v731_v12, %v360_v7  ;;  %v750_v25 = vmul.f32 %v731_v12, %v361_v8 }
 0x3db   : > { %v751_v27 = vmul.f32 %v732_v14, %v360_v7  ;;  %v761_v28 = vmul.f32 1.442695, %v745_v15  ;;  %v763_v29 = vmul.f32 1.442695, %v746_v16  ;;  %v752_v31 = vmul.f32 %v732_v14, %v361_v8 }
 0x3dc   : > { %v765_v30 = vmul.f32 1.442695, %v747_v17  ;;  %v767_v32 = vmul.f32 1.442695, %v748_v19  ;;  %v753_v34 = vmul.f32 %v733_v21, %v360_v7  ;;  %v769_v36 = vmul.f32 1.442695, %v749_v22 }
 0x3dd   : > { %2447 = vpow2.f32 %v761_v28  ;;  %v754_v38 = vmul.f32 %v733_v21, %v361_v8  ;;  %v771_v39 = vmul.f32 1.442695, %v750_v25  ;;  %v736_v40 = vperm.slane %v728_v23, 0 }
 0x3de   : > { %2449 = vpow2.f32 %v763_v29  ;;  %v755_v41 = vmul.f32 %v734_v24, %v360_v7  ;;  %v773_v42 = vmul.f32 1.442695, %v751_v27  ;;  %v756_v43 = vmul.f32 %v734_v24, %v361_v8 }
 0x3df   : > { %893 = vperm.xlu1 %2346, %v2996_v26   ;;  %887 = vperm.xlu2 %2345, %v2996_v26   ;;  %2451 = vpow2.f32 %v765_v30  ;;  %v775_v44 = vmul.f32 1.442695, %v752_v31  ;;  %v757_v45 = vmul.f32 %v735_v33, %v360_v7  ;;  %v777_v47 = vmul.f32 1.442695, %v753_v34 }
 0x3e0   : > { %848 = vperm.xlu0 %2343, %v2968_v58   ;;  %2453 = vpow2.f32 %v767_v32  ;;  %v758_v48 = vmul.f32 %v735_v33, %v361_v8  ;;  %v779_v49 = vmul.f32 1.442695, %v754_v38  ;;  %v759_v55 = vmul.f32 %v736_v40, %v360_v7 }
 0x3e1   : > { %2455 = vpow2.f32 %v769_v36  ;;  %v781_v56 = vmul.f32 1.442695, %v755_v41  ;;  %v760_v60 = vmul.f32 %v736_v40, %v361_v8  ;;  %v783_v61 = vmul.f32 1.442695, %v756_v43 }
 0x3e2   : > { %2457 = vpow2.f32 %v771_v39  ;;  %v785_v2 = vmul.f32 1.442695, %v757_v45  ;;  %v787_v5 = vmul.f32 1.442695, %v758_v48  ;;  %v789_v7 = vmul.f32 1.442695, %v759_v55 }
 0x3e3   : > { %v2448_v54 = vpop.eup %2447  ;;  %2459 = vpow2.f32 %v773_v42  ;;  %v791_v9 = vmul.f32 1.442695, %v760_v60  ;;  %v923_v10 = vadd.s32 16, %v2944_v35  ;;  %v3011_v22 = vperm.slane %v2956_v50, 7 }
 0x3e4   : > { %v2450_v57 = vpop.eup %2449  ;;  %2461 = vpow2.f32 %v775_v44  ;;  %793 = vst [vmem:[#allocation3 + $0x28] sm:$0xff] %v2448_v54  ;;  %v1019_v23 = vadd.s32 32, %v2944_v35  ;;  %v1025_v27 = vadd.s32 40, %v2944_v35  ;;  %v3062_v40 = vadd.s32 56, %v2944_v35 }
 0x3e5   : > { %v2452_v63 = vpop.eup %2451  ;;  %2463 = vpow2.f32 %v777_v47  ;;  %794 = vst [vmem:[#allocation3 + $0x50] sm:$0xff] %v2450_v57 }
 0x3e6   : > { %v2454_v4 = vpop.eup %2453  ;;  %2465 = vpow2.f32 %v779_v49  ;;  %795 = vst [vmem:[#allocation3 + $0x10] sm:$0xff] %v2452_v63  ;;  %v3078_v49 = vadd.s32 48, %v2944_v35  ;;  %v3096_v63 = vadd.s32 64, %v2944_v35 }
 0x3e7   : > { %906 = vperm.xlu1 %2346, %v3002_v51   ;;  %900 = vperm.xlu2 %2345, %v3002_v51   ;;  %v2456_v6 = vpop.eup %2455  ;;  %2467 = vpow2.f32 %v781_v56  ;;  %796 = vst [vmem:[#allocation3 + $0x48] sm:$0xff] %v2454_v4 }
 0x3e8   : > { %2344 = vset.pattern.permute.xlu0 %v2949_v37  ;;  %v2458_v8 = vpop.eup %2457  ;;  %2469 = vpow2.f32 %v783_v61  ;;  %797 = vst [vmem:[#allocation3 + $0x60] sm:$0xff] %v2456_v6 }
 0x3e9   : > { %v2460_v11 = vpop.eup %2459  ;;  %2471 = vpow2.f32 %v785_v2  ;;  %798 = vst [vmem:[#allocation3] sm:$0xff] %v2458_v8 }
 0x3ea   : > { %v2462_v12 = vpop.eup %2461  ;;  %2473 = vpow2.f32 %v787_v5  ;;  %799 = vst [vmem:[#allocation3 + $0x40] sm:$0xff] %v2460_v11 }
 0x3eb   : > { %v2464_v13 = vpop.eup %2463  ;;  %2475 = vpow2.f32 %v789_v7  ;;  %800 = vst [vmem:[#allocation3 + $0x78] sm:$0xff] %v2462_v12 }
 0x3ec   : > { %v2466_v14 = vpop.eup %2465  ;;  %2477 = vpow2.f32 %v791_v9  ;;  %801 = vst [vmem:[#allocation3 + $0x18] sm:$0xff] %v2464_v13  ;;  %v3113_v9 = vadd.s32 72, %v2944_v35 }
 0x3ed   : > { %v2468_v15 = vpop.eup %2467  ;;  %802 = vst [vmem:[#allocation3 + $0x8] sm:$0xff] %v2466_v14 }
 0x3ee   : > { %v2470_v16 = vpop.eup %2469  ;;  %803 = vst [vmem:[#allocation3 + $0x30] sm:$0xff] %v2468_v15 }
 0x3ef   : > { %2349 = vset.pattern.permute.xlu1 %v923_v10  ;;  %2348 = vset.pattern.permute.xlu2 %v2949_v37  ;;  %v2472_v17 = vpop.eup %2471  ;;  %804 = vst [vmem:[#allocation3 + $0x58] sm:$0xff] %v2470_v16  ;;  %v929_v37 = vadd.s32 24, %v2944_v35 }
 0x3f0   : > { %880 = vperm.xlu0 %2344, %v2977_v62   ;;  %v2474_v19 = vpop.eup %2473  ;;  %805 = vst [vmem:[#allocation3 + $0x68] sm:$0xff] %v2472_v17 }
 0x3f1   : > { %v2476_v20 = vpop.eup %2475  ;;  %806 = vst [vmem:[#allocation3 + $0x70] sm:$0xff] %v2474_v19 }
 0x3f2   : > { %v2478_v21 = vpop.eup %2477  ;;  %807 = vst [vmem:[#allocation3 + $0x20] sm:$0xff] %v2476_v20 }
 0x3f3   : > { %808 = vst [vmem:[#allocation3 + $0x38] sm:$0xff] %v2478_v21 }
 0x3f7   : > { %925 = vperm.xlu1 %2349, %v2959_v52   ;;  %919 = vperm.xlu2 %2348, %v3011_v22  }
 0x3f8   : > { %2347 = vset.pattern.permute.xlu0 %v2944_v35 }
 0x3ff   : > { %937 = vperm.xlu1 %2349, %v2962_v53   ;;  %2350 = vset.pattern.permute.xlu2 %v929_v37 }
 0x400   : > { %913 = vperm.xlu0 %2347, %v3011_v22  }
 0x407   : > { %2353 = vset.pattern.permute.xlu1 %v929_v37  ;;  %931 = vperm.xlu2 %2350, %v2959_v52  }
 0x408   : > { %2351 = vset.pattern.permute.xlu0 %v929_v37 }
 0x40f   : > { %955 = vperm.xlu1 %2353, %v2968_v58   ;;  %2352 = vset.pattern.permute.xlu2 %v923_v10 }
 0x410   : > { %943 = vperm.xlu0 %2351, %v2962_v53  }
 0x417   : > { %967 = vperm.xlu1 %2353, %v2971_v59   ;;  %949 = vperm.xlu2 %2352, %v2968_v58  }
 0x418   : > { %2354 = vset.pattern.permute.xlu0 %v923_v10 }
 0x419   : > { %v3030_v50 = vpop.permute.xlu2 %828 }
 0x41f   : > { %2356 = vset.pattern.permute.xlu1 %v923_v10  ;;  %961 = vperm.xlu2 %2352, %v2971_v59  }
 0x420   : > { %973 = vperm.xlu0 %2354, %v2977_v62  }
 0x421   : > { %v3036_v25 = vpop.permute.xlu2 %854 }
 0x427   : > { %985 = vperm.xlu1 %2356, %v2996_v26   ;;  %2355 = vset.pattern.permute.xlu2 %v929_v37 }
 0x428   : > { %2357 = vset.pattern.permute.xlu0 %v929_v37 }
 0x429   : > { %v3043_v29 = vpop.permute.xlu2 %867 }
 0x42f   : > { %997 = vperm.xlu1 %2356, %v3002_v51   ;;  %979 = vperm.xlu2 %2355, %v2977_v62  }
 0x430   : > { %1003 = vperm.xlu0 %2357, %v3002_v51  }
 0x431   : > { %v3034_v24 = vpop.permute.xlu1 %835 }
 0x432   : > { %v823_v34 = vpop.permute.xlu0 %822 }
 0x437   : > { %2359 = vset.pattern.permute.xlu1 %v929_v37  ;;  %991 = vperm.xlu2 %2355, %v2996_v26  }
 0x438   : > { %2362 = vset.pattern.permute.xlu0 %v1019_v23 }
 0x439   : > { %v3041_v28 = vpop.permute.xlu1 %861  ;;  %v3046_v30 = vpop.permute.xlu2 %887 }
 0x43f   : > { %1015 = vperm.xlu1 %2359, %v3011_v22   ;;  %2358 = vset.pattern.permute.xlu2 %v923_v10 }
 0x440   : > { %1033 = vperm.xlu0 %2362, %v2962_v53  }
 0x441   : > { %v3048_v31 = vpop.permute.xlu1 %874  ;;  %v3055_v33 = vpop.permute.xlu2 %900 }
 0x442   : > { %v842_v39 = vpop.permute.xlu0 %841 }
 0x447   : > { %2361 = vset.pattern.permute.xlu1 %v1025_v27  ;;  %1009 = vperm.xlu2 %2358, %v3011_v22  }
 0x448   : > { %2365 = vset.pattern.permute.xlu0 %v1025_v27 }
 0x44f   : > { %1027 = vperm.xlu1 %2361, %v2959_v52   ;;  %2360 = vset.pattern.permute.xlu2 %v1019_v23 }
 0x450   : > { %1063 = vperm.xlu0 %2365, %v2971_v59  }
 0x451   : > { %v3052_v32 = vpop.permute.xlu1 %893  ;;  %v3059_v36 = vpop.permute.xlu2 %919 }
 0x452   : > { %v849_v43 = vpop.permute.xlu0 %848 }
 0x457   : > { %2364 = vset.pattern.permute.xlu1 %v1019_v23  ;;  %1021 = vperm.xlu2 %2360, %v2959_v52  }
 0x458   : > { %2368 = vset.pattern.permute.xlu0 %v1019_v23 }
 0x459   : > { %v907_v38 = vpop.permute.xlu1 %906 }
 0x45f   : > { %1045 = vperm.xlu1 %2364, %v2968_v58   ;;  %2363 = vset.pattern.permute.xlu2 %v1025_v27 }
 0x460   : > { %1093 = vperm.xlu0 %2368, %v3002_v51  }
 0x461   : > { %v3067_v41 = vpop.permute.xlu2 %931 }
 0x462   : > { %v881_v47 = vpop.permute.xlu0 %880 }
 0x467   : > { %1057 = vperm.xlu1 %2364, %v2971_v59   ;;  %1039 = vperm.xlu2 %2363, %v2962_v53  }
 0x468   : > { %2372 = vset.pattern.permute.xlu0 %v3062_v40 }
 0x469   : > { %v926_v42 = vpop.permute.xlu1 %925 }
 0x46a   : > { %v3070_v44 = vsel %vm362_vm0, %v823_v34, %v926_v42 }
 0x46f   : > { %2367 = vset.pattern.permute.xlu1 %v1025_v27  ;;  %1051 = vperm.xlu2 %2363, %v2968_v58  }
 0x470   : > { %1123 = vperm.xlu0 %2372, %v2959_v52  }
 0x471   : > { %v950_v45 = vpop.permute.xlu2 %949  ;;  %v3115_v10 = vpop.permute.xlu1 %937 }
 0x472   : > { %v3075_v48 = vsel %vm362_vm0, %v849_v43, %v950_v45  ;;  %v914_v54 = vpop.permute.xlu0 %913 }
 0x477   : > { %1075 = vperm.xlu1 %2367, %v2977_v62   ;;  %2366 = vset.pattern.permute.xlu2 %v1019_v23 }
 0x478   : > { %2375 = vset.pattern.permute.xlu0 %v3078_v49 }
 0x479   : > { %v3085_v55 = vpop.permute.xlu2 %961 }
 0x47f   : > { %1087 = vperm.xlu1 %2367, %v2996_v26   ;;  %1069 = vperm.xlu2 %2366, %v2977_v62  }
 0x480   : > { %1153 = vperm.xlu0 %2375, %v2971_v59  }
 0x481   : > { %v956_v11 = vpop.permute.xlu1 %955 }
 0x482   : > { %v944_v56 = vpop.permute.xlu0 %943  ;;  %v1214_v37 = vsel %vm362_vm0, %v3036_v25, %v956_v11  ;;  %v3158_v25 = vadd.s32 80, %v2944_v35  ;;  %v1215_v11 = vsel %vm362_vm0, %v3041_v28, %v3085_v55 }
 0x483   : > { %v1212_v57 = vsel %vm362_vm0, %v842_v39, %v944_v56 }
 0x487   : > { %2370 = vset.pattern.permute.xlu1 %v1019_v23  ;;  %1081 = vperm.xlu2 %2366, %v2996_v26  }
 0x488   : > { %2378 = vset.pattern.permute.xlu0 %v3062_v40 }
 0x489   : > { %v980_v60 = vpop.permute.xlu2 %979  ;;  %v968_v12 = vpop.permute.xlu1 %967 }
 0x48a   : > { %v3091_v61 = vsel %vm362_vm0, %v881_v47, %v980_v60  ;;  %v1216_v17 = vsel %vm362_vm0, %v3043_v29, %v968_v12 }
 0x48f   : > { %1105 = vperm.xlu1 %2370, %v3011_v22   ;;  %2369 = vset.pattern.permute.xlu2 %v1025_v27 }
 0x490   : > { %1183 = vperm.xlu0 %2378, %v2996_v26  }
 0x491   : > { %v3101_v2 = vpop.permute.xlu2 %991 }
 0x492   : > { %v974_v4 = vpop.permute.xlu0 %973 }
 0x493   : > { %v1217_v43 = vsel %vm362_vm0, %v3048_v31, %v974_v4  ;;  %v1210_v31 = vsel %vm362_vm0, %v3030_v50, %v3067_v41  ;;  %v3189_v50 = vadd.s32 88, %v2944_v35 }
 0x497   : > { %2371 = vset.pattern.permute.xlu1 %v3078_v49  ;;  %1099 = vperm.xlu2 %2369, %v3002_v51  }
 0x498   : > { %2381 = vset.pattern.permute.xlu0 %v3096_v63 }
 0x499   : > { %v986_v15 = vpop.permute.xlu1 %985 }
 0x49f   : > { %1117 = vperm.xlu1 %2371, %v2959_v52   ;;  %1111 = vperm.xlu2 %2369, %v3011_v22  }
 0x4a0   : > { %1310 = vperm.xlu0 %2381, %v2959_v52  }
 0x4a1   : > { %v1010_v5 = vpop.permute.xlu2 %1009  ;;  %v998_v29 = vpop.permute.xlu1 %997 }
 0x4a2   : > { %v3107_v6 = vsel %vm362_vm0, %v914_v54, %v1010_v5  ;;  %v1004_v7 = vpop.permute.xlu0 %1003  ;;  %v1221_v34 = vsel %vm362_vm0, %v3055_v33, %v998_v29  ;;  %v3170_v54 = vmul.f32 %v2982_v3, %v2952_v46 }
 0x4a3   : > { %v3110_v8 = vsel %vm362_vm0, %v907_v38, %v1004_v7 }
 0x4a4   : > { %v1258_v60 = vperm.slane %v3170_v54, 0  ;;  %v812_v41 = vrot.slane %v3170_v54, 3 }
 0x4a7   : > { %2374 = vset.pattern.permute.xlu1 %v3062_v40  ;;  %2373 = vset.pattern.permute.xlu2 %v3078_v49 }
 0x4a8   : > { %2384 = vset.pattern.permute.xlu0 %v3113_v9 }
 0x4af   : > { %1135 = vperm.xlu1 %2374, %v2962_v53   ;;  %1129 = vperm.xlu2 %2373, %v2962_v53  }
 0x4b0   : > { %1340 = vperm.xlu0 %2384, %v2968_v58  }
 0x4b1   : > { %v3126_v13 = vpop.permute.xlu2 %1021  ;;  %v1016_v39 = vpop.permute.xlu1 %1015 }
 0x4b2   : > { %v3128_v14 = vpop.permute.xlu0 %1033  ;;  %v1224_v28 = vsel %vm362_vm0, %v3059_v36, %v1016_v39 }
 0x4b7   : > { %1147 = vperm.xlu1 %2374, %v2968_v58   ;;  %1141 = vperm.xlu2 %2373, %v2968_v58  }
 0x4b8   : > { %2387 = vset.pattern.permute.xlu0 %v3096_v63 }
 0x4bf   : > { %2377 = vset.pattern.permute.xlu1 %v3078_v49  ;;  %2376 = vset.pattern.permute.xlu2 %v3062_v40 }
 0x4c0   : > { %1370 = vperm.xlu0 %2387, %v2996_v26  }
 0x4c1   : > { %v1040_v16 = vpop.permute.xlu2 %1039  ;;  %v1028_v47 = vpop.permute.xlu1 %1027 }
 0x4c2   : > { %v3136_v19 = vsel %vm461_vm8, %v1212_v57, %v1040_v16  ;;  %v1064_v20 = vpop.permute.xlu0 %1063  ;;  %v1226_v56 = vsel %vm461_vm8, %v1210_v31, %v1028_v47 }
 0x4c3   : > { %v3139_v21 = vsel %vm461_vm8, %v1216_v17, %v1064_v20  ;;  %v3206_v20 = vperm.slane %v812_v41, 0  ;;  %v811_v41 = vrot.slane %v3170_v54, 2 }
 0x4c7   : > { %1165 = vperm.xlu1 %2377, %v2977_v62   ;;  %1159 = vperm.xlu2 %2376, %v2971_v59  }
 0x4c8   : > { %2390 = vset.pattern.permute.xlu0 %v3113_v9 }
 0x4c9   : > { %v1052_v23 = vpop.permute.xlu2 %1051 }
 0x4ca   : > { %v3147_v27 = vsel %vm461_vm8, %v1214_v37, %v1052_v23 }
 0x4cf   : > { %1177 = vperm.xlu1 %2377, %v2996_v26   ;;  %1171 = vperm.xlu2 %2376, %v2977_v62  }
 0x4d0   : > { %1400 = vperm.xlu0 %2390, %v3011_v22  }
 0x4d1   : > { %v1046_v4 = vpop.permute.xlu1 %1045 }
 0x4d2   : > { %v1094_v38 = vpop.permute.xlu0 %1093 }
 0x4d3   : > { %v3155_v42 = vsel %vm461_vm8, %v1221_v34, %v1094_v38  ;;  %v814_v34 = vrot.slane %v3170_v54, 5 }
 0x4d5   : > { %v3228_v39 = vperm.slane %v814_v34, 0  ;;  %v813_v34 = vrot.slane %v3170_v54, 4 }
 0x4d7   : > { %2380 = vset.pattern.permute.xlu1 %v3062_v40  ;;  %2379 = vset.pattern.permute.xlu2 %v3078_v49  ;;  %v1219_v40 = vsel %vm362_vm0, %v3046_v30, %v986_v15 }
 0x4d8   : > { %2393 = vset.pattern.permute.xlu0 %v3158_v25 }
 0x4d9   : > { %v1070_v45 = vpop.permute.xlu2 %1069  ;;  %v1058_v30 = vpop.permute.xlu1 %1057 }
 0x4da   : > { %v3166_v33 = vsel %vm461_vm8, %v1217_v43, %v1070_v45  ;;  %v1231_v15 = vsel %vm461_vm8, %v1215_v11, %v1058_v30  ;;  %v1220_v43 = vsel %vm362_vm0, %v3052_v32, %v3101_v2  ;;  %v1211_v32 = vsel %vm362_vm0, %v3034_v24, %v3115_v10 }
 0x4db   : > { %v1227_v2 = vsel %vm461_vm8, %v1211_v32, %v3128_v14  ;;  %v1225_v24 = vsel %vm461_vm8, %v3070_v44, %v3126_v13  ;;  %v1229_v10 = vsel %vm461_vm8, %v3075_v48, %v1046_v4 }
 0x4df   : > { %1195 = vperm.xlu1 %2380, %v3002_v51   ;;  %1189 = vperm.xlu2 %2379, %v3002_v51  }
 0x4e0   : > { %1430 = vperm.xlu0 %2393, %v2968_v58  }
 0x4e1   : > { %v1082_v49 = vpop.permute.xlu2 %1081 }
 0x4e2   : > { %v3182_v3 = vsel %vm461_vm8, %v1219_v40, %v1082_v49  ;;  %v1124_v57 = vpop.permute.xlu0 %1123  ;;  %v3233_v40 = vadd.s32 104, %v2944_v35  ;;  %v810_v49 = vrot.slane %v3170_v54, 1 }
 0x4e3   : > { %v1243_v5 = vsel %vm1241_vm15, %v1226_v56, %v1124_v57 }
 0x4e4   : > { %v1275_v7 = vmul.f32 %v1258_v60, %v1243_v5  ;;  %v1259_v5 = vperm.slane %v810_v49, 0 }
 0x4e6   : > { %1291 = vst [vmem:[#allocation4 + $0x30] sm:$0xff] %v1275_v7 }
 0x4e7   : > { %1207 = vperm.xlu1 %2380, %v3011_v22   ;;  %1201 = vperm.xlu2 %2379, %v3011_v22  }
 0x4e8   : > { %2396 = vset.pattern.permute.xlu0 %v3189_v50 }
 0x4e9   : > { %v3210_v29 = vpop.permute.xlu1 %1075 }
 0x4ef   : > { %2383 = vset.pattern.permute.xlu1 %v3096_v63  ;;  %2382 = vset.pattern.permute.xlu2 %v3113_v9 }
 0x4f0   : > { %1460 = vperm.xlu0 %2396, %v2977_v62  }
 0x4f1   : > { %v1100_v12 = vpop.permute.xlu2 %1099  ;;  %v1088_v38 = vpop.permute.xlu1 %1087 }
 0x4f2   : > { %v3204_v16 = vsel %vm461_vm8, %v3110_v8, %v1100_v12  ;;  %v1154_v17 = vpop.permute.xlu0 %1153  ;;  %v1236_v45 = vsel %vm461_vm8, %v1220_v43, %v1088_v38  ;;  %v1260_v12 = vperm.slane %v811_v41, 0 }
 0x4f3   : > { %v1248_v37 = vsel %vm1241_vm15, %v1231_v15, %v1154_v17 }
 0x4f4   : > { %v1280_v23 = vmul.f32 %v3206_v20, %v1248_v37 }
 0x4f6   : > { %1296 = vst [vmem:[#allocation4 + $0x10] sm:$0xff] %v1280_v23 }
 0x4f7   : > { %1322 = vperm.xlu1 %2383, %v2962_v53   ;;  %1316 = vperm.xlu2 %2382, %v2959_v52  }
 0x4f8   : > { %2399 = vset.pattern.permute.xlu0 %v3158_v25 }
 0x4f9   : > { %v1112_v55 = vpop.permute.xlu2 %1111 }
 0x4fa   : > { %v3218_v8 = vsel %vm461_vm8, %v1224_v28, %v1112_v55  ;;  %v3261_v28 = vadd.s32 96, %v2944_v35 }
 0x4ff   : > { %1334 = vperm.xlu1 %2383, %v2968_v58   ;;  %1328 = vperm.xlu2 %2382, %v2962_v53  }
 0x500   : > { %1490 = vperm.xlu0 %2399, %v3011_v22  }
 0x501   : > { %v3244_v56 = vpop.permute.xlu1 %1105 }
 0x502   : > { %v1184_v36 = vpop.permute.xlu0 %1183 }
 0x503   : > { %v1253_v47 = vsel %vm1241_vm15, %v1236_v45, %v1184_v36 }
 0x504   : > { %v1285_v31 = vmul.f32 %v3228_v39, %v1253_v47 }
 0x506   : > { %1301 = vst [vmem:[#allocation4 + $0x40] sm:$0xff] %v1285_v31 }
 0x507   : > { %2386 = vset.pattern.permute.xlu1 %v3113_v9  ;;  %2385 = vset.pattern.permute.xlu2 %v3096_v63 }
 0x508   : > { %2403 = vset.pattern.permute.xlu0 %v3233_v40 }
 0x509   : > { %v1130_v57 = vpop.permute.xlu2 %1129 }
 0x50a   : > { %v1244_v7 = vsel %vm1241_vm15, %v1227_v2, %v1130_v57  ;;  %v816_v57 = vrot.slane %v3170_v54, 7 }
 0x50b   : > { %v1276_v30 = vmul.f32 %v1259_v5, %v1244_v7 }
 0x50d   : > { %1292 = vst [vmem:[#allocation4 + $0x38] sm:$0xff] %v1276_v30  ;;  %v1265_v30 = vperm.slane %v816_v57, 0 }
 0x50f   : > { %1352 = vperm.xlu1 %2386, %v2971_v59   ;;  %1346 = vperm.xlu2 %2385, %v2971_v59  }
 0x510   : > { %1520 = vperm.xlu0 %2403, %v2962_v53  }
 0x511   : > { %v1118_v14 = vpop.permute.xlu1 %1117  ;;  %v1142_v11 = vpop.permute.xlu2 %1141 }
 0x512   : > { %v1242_v15 = vsel %vm1241_vm15, %v1225_v24, %v1118_v14  ;;  %v1246_v17 = vsel %vm1241_vm15, %v1229_v10, %v1142_v11  ;;  %v3310_v10 = vadd.s32 120, %v2944_v35 }
 0x513   : > { %v1274_v37 = vmul.f32 %v1258_v60, %v1242_v15  ;;  %v1278_v23 = vmul.f32 %v1260_v12, %v1246_v17 }
 0x515   : > { %1290 = vst [vmem:[#allocation4] sm:$0xff] %v1274_v37 }
 0x516   : > { %1294 = vst [vmem:[#allocation4 + $0x60] sm:$0xff] %v1278_v23 }
 0x517   : > { %1364 = vperm.xlu1 %2386, %v2977_v62   ;;  %1358 = vperm.xlu2 %2385, %v2977_v62  }
 0x518   : > { %2406 = vset.pattern.permute.xlu0 %v3261_v28 }
 0x51f   : > { %2389 = vset.pattern.permute.xlu1 %v3096_v63  ;;  %2388 = vset.pattern.permute.xlu2 %v3113_v9  ;;  %v1234_v63 = vsel %vm461_vm8, %v3091_v61, %v3210_v29  ;;  %v3288_v61 = vadd.s32 112, %v2944_v35  ;;  %v815_v29 = vrot.slane %v3170_v54, 6 }
 0x520   : > { %1550 = vperm.xlu0 %2406, %v2977_v62  }
 0x521   : > { %v1136_v44 = vpop.permute.xlu1 %1135  ;;  %v1160_v48 = vpop.permute.xlu2 %1159  ;;  %v1264_v47 = vperm.slane %v815_v29, 0 }
 0x522   : > { %v1245_v13 = vsel %vm1241_vm15, %v3136_v19, %v1136_v44  ;;  %v1249_v60 = vsel %vm1241_vm15, %v3139_v21, %v1160_v48  ;;  %v1262_v21 = vperm.slane %v813_v34, 0 }
 0x523   : > { %v1277_v4 = vmul.f32 %v1259_v5, %v1245_v13  ;;  %v1281_v55 = vmul.f32 %v3206_v20, %v1249_v60  ;;  %v1239_v5 = vsel %vm461_vm8, %v3107_v6, %v3244_v56  ;;  %v3318_v6 = vpop.permute.xlu0 %1310 }
 0x525   : > { %1293 = vst [vmem:[#allocation4 + $0x20] sm:$0xff] %v1277_v4 }
 0x526   : > { %1297 = vst [vmem:[#allocation4 + $0x68] sm:$0xff] %v1281_v55 }
 0x527   : > { %1382 = vperm.xlu1 %2389, %v3002_v51   ;;  %1376 = vperm.xlu2 %2388, %v2996_v26  }
 0x528   : > { %2409 = vset.pattern.permute.xlu0 %v3233_v40 }
 0x529   : > { %v1148_v9 = vpop.permute.xlu1 %1147  ;;  %v1172_v19 = vpop.permute.xlu2 %1171 }
 0x52a   : > { %v1247_v20 = vsel %vm1241_vm15, %v3147_v27, %v1148_v9  ;;  %v1251_v38 = vsel %vm1241_vm15, %v1234_v63, %v1172_v19 }
 0x52b   : > { %v1279_v43 = vmul.f32 %v1260_v12, %v1247_v20  ;;  %v1283_v45 = vmul.f32 %v1262_v21, %v1251_v38  ;;  %v3325_v56 = vpop.permute.xlu0 %1340 }
 0x52d   : > { %1295 = vst [vmem:[#allocation4 + $0x28] sm:$0xff] %v1279_v43 }
 0x52e   : > { %1299 = vst [vmem:[#allocation4 + $0x78] sm:$0xff] %v1283_v45 }
 0x52f   : > { %1394 = vperm.xlu1 %2389, %v3011_v22   ;;  %1388 = vperm.xlu2 %2388, %v3002_v51  }
 0x530   : > { %1580 = vperm.xlu0 %2409, %v3002_v51  }
 0x537   : > { %2392 = vset.pattern.permute.xlu1 %v3189_v50  ;;  %2391 = vset.pattern.permute.xlu2 %v3158_v25 }
 0x538   : > { %2414 = vset.pattern.permute.xlu0 %v3288_v61 }
 0x539   : > { %v1166_v27 = vpop.permute.xlu1 %1165  ;;  %v1190_v36 = vpop.permute.xlu2 %1189 }
 0x53a   : > { %v1250_v31 = vsel %vm1241_vm15, %v3166_v33, %v1166_v27  ;;  %v1254_v49 = vsel %vm1241_vm15, %v3155_v42, %v1190_v36 }
 0x53b   : > { %v1282_v32 = vmul.f32 %v1262_v21, %v1250_v31  ;;  %v1286_v2 = vmul.f32 %v1264_v47, %v1254_v49 }
 0x53d   : > { %1298 = vst [vmem:[#allocation4 + $0x8] sm:$0xff] %v1282_v32 }
 0x53e   : > { %1302 = vst [vmem:[#allocation4 + $0x48] sm:$0xff] %v1286_v2 }
 0x53f   : > { %1412 = vperm.xlu1 %2392, %v2959_v52   ;;  %1406 = vperm.xlu2 %2391, %v2959_v52  }
 0x540   : > { %1610 = vperm.xlu0 %2414, %v2962_v53  }
 0x541   : > { %v1178_v33 = vpop.permute.xlu1 %1177  ;;  %v1202_v7 = vpop.permute.xlu2 %1201 }
 0x542   : > { %v1252_v42 = vsel %vm1241_vm15, %v3182_v3, %v1178_v33  ;;  %v1256_v41 = vsel %vm1241_vm15, %v1239_v5, %v1202_v7 }
 0x543   : > { %v1284_v54 = vmul.f32 %v3228_v39, %v1252_v42  ;;  %v1288_v24 = vmul.f32 %v1265_v30, %v1256_v41 }
 0x545   : > { %1300 = vst [vmem:[#allocation4 + $0x50] sm:$0xff] %v1284_v54 }
 0x546   : > { %1304 = vst [vmem:[#allocation4 + $0x70] sm:$0xff] %v1288_v24 }
 0x547   : > { %1424 = vperm.xlu1 %2392, %v2962_v53   ;;  %1418 = vperm.xlu2 %2391, %v2962_v53  }
 0x548   : > { %2417 = vset.pattern.permute.xlu0 %v3310_v10 }
 0x54f   : > { %2395 = vset.pattern.permute.xlu1 %v3158_v25  ;;  %2394 = vset.pattern.permute.xlu2 %v3189_v50 }
 0x550   : > { %1640 = vperm.xlu0 %2417, %v2971_v59  }
 0x551   : > { %v1196_v3 = vpop.permute.xlu1 %1195  ;;  %v3352_v44 = vpop.permute.xlu2 %1316 }
 0x552   : > { %v1255_v35 = vsel %vm1241_vm15, %v3204_v16, %v1196_v3  ;;  %v3332_v16 = vpop.permute.xlu0 %1370 }
 0x553   : > { %v1287_v39 = vmul.f32 %v1264_v47, %v1255_v35 }
 0x555   : > { %1303 = vst [vmem:[#allocation4 + $0x58] sm:$0xff] %v1287_v39 }
 0x557   : > { %1442 = vperm.xlu1 %2395, %v2971_v59   ;;  %1436 = vperm.xlu2 %2394, %v2968_v58  }
 0x558   : > { %2420 = vset.pattern.permute.xlu0 %v3288_v61 }
 0x559   : > { %v1208_v14 = vpop.permute.xlu1 %1207  ;;  %v1329_v4 = vpop.permute.xlu2 %1328 }
 0x55a   : > { %v1257_v11 = vsel %vm1241_vm15, %v3218_v8, %v1208_v14  ;;  %v3337_v15 = vpop.permute.xlu0 %1400 }
 0x55b   : > { %v1289_v12 = vmul.f32 %v1265_v30, %v1257_v11 }
 0x55d   : > { %1305 = vst [vmem:[#allocation4 + $0x18] sm:$0xff] %v1289_v12 }
 0x55f   : > { %1454 = vperm.xlu1 %2395, %v2977_v62   ;;  %1448 = vperm.xlu2 %2394, %v2971_v59  }
 0x560   : > { %1670 = vperm.xlu0 %2420, %v3002_v51  }
 0x562   : > { %v1431_v8 = vpop.permute.xlu0 %1430 }
 0x567   : > { %2398 = vset.pattern.permute.xlu1 %v3189_v50  ;;  %2397 = vset.pattern.permute.xlu2 %v3158_v25 }
 0x568   : > { %2423 = vset.pattern.permute.xlu0 %v3310_v10 }
 0x569   : > { %v3339_v17 = vpop.permute.xlu1 %1322  ;;  %v3361_v55 = vpop.permute.xlu2 %1346 }
 0x56a   : > { %v1461_v48 = vpop.permute.xlu0 %1460 }
 0x56f   : > { %1472 = vperm.xlu1 %2398, %v2996_v26   ;;  %1466 = vperm.xlu2 %2397, %v2996_v26  }
 0x571   : > { %v1335_v37 = vpop.permute.xlu1 %1334  ;;  %v1359_v34 = vpop.permute.xlu2 %1358 }
 0x572   : > { %v3344_v23 = vsel %vm362_vm0, %v1335_v37, %v1431_v8  ;;  %v1491_v63 = vpop.permute.xlu0 %1490 }
 0x577   : > { %1484 = vperm.xlu1 %2398, %v3002_v51   ;;  %1478 = vperm.xlu2 %2397, %v3002_v51  }
 0x57f   : > { %2401 = vset.pattern.permute.xlu1 %v3261_v28  ;;  %2400 = vset.pattern.permute.xlu2 %v3189_v50 }
 0x581   : > { %v3350_v25 = vpop.permute.xlu1 %1352  ;;  %v3374_v21 = vpop.permute.xlu2 %1376 }
 0x582   : > { %v1521_v45 = vpop.permute.xlu0 %1520 }
 0x587   : > { %1502 = vperm.xlu1 %2401, %v2959_v52   ;;  %1496 = vperm.xlu2 %2400, %v3011_v22  }
 0x589   : > { %v1365_v13 = vpop.permute.xlu1 %1364  ;;  %v1389_v38 = vpop.permute.xlu2 %1388 }
 0x58a   : > { %v3357_v60 = vsel %vm362_vm0, %v1365_v13, %v1461_v48 }
 0x58f   : > { %1514 = vperm.xlu1 %2401, %v2962_v53   ;;  %2402 = vset.pattern.permute.xlu2 %v3233_v40 }
 0x592   : > { %v1551_v2 = vpop.permute.xlu0 %1550 }
 0x597   : > { %2405 = vset.pattern.permute.xlu1 %v3233_v40  ;;  %1508 = vperm.xlu2 %2402, %v2959_v52  }
 0x599   : > { %v3365_v50 = vpop.permute.xlu1 %1382  ;;  %v1407_v27 = vpop.permute.xlu2 %1406 }
 0x59f   : > { %1532 = vperm.xlu1 %2405, %v2968_v58   ;;  %2404 = vset.pattern.permute.xlu2 %v3261_v28 }
 0x5a1   : > { %v1395_v9 = vpop.permute.xlu1 %1394  ;;  %v1419_v47 = vpop.permute.xlu2 %1418 }
 0x5a2   : > { %v3370_v19 = vsel %vm362_vm0, %v1395_v9, %v1491_v63  ;;  %v1581_v42 = vpop.permute.xlu0 %1580  ;;  %v1692_v14 = vsel %vm362_vm0, %v3339_v17, %v1419_v47 }
 0x5a7   : > { %1544 = vperm.xlu1 %2405, %v2971_v59   ;;  %1526 = vperm.xlu2 %2404, %v2968_v58  }
 0x5af   : > { %2408 = vset.pattern.permute.xlu1 %v3261_v28  ;;  %1538 = vperm.xlu2 %2404, %v2971_v59  }
 0x5b1   : > { %v3378_v20 = vpop.permute.xlu1 %1412  ;;  %v1437_v49 = vpop.permute.xlu2 %1436 }
 0x5b2   : > { %v1611_v8 = vpop.permute.xlu0 %1610 }
 0x5b7   : > { %1562 = vperm.xlu1 %2408, %v2996_v26   ;;  %2407 = vset.pattern.permute.xlu2 %v3233_v40 }
 0x5b9   : > { %v1425_v43 = vpop.permute.xlu1 %1424  ;;  %v1449_v33 = vpop.permute.xlu2 %1448 }
 0x5ba   : > { %v1693_v29 = vsel %vm362_vm0, %v1329_v4, %v1425_v43  ;;  %v1697_v4 = vsel %vm362_vm0, %v3350_v25, %v1449_v33 }
 0x5bb   : > { %v3384_v36 = vsel %vm461_vm8, %v1693_v29, %v1521_v45 }
 0x5bf   : > { %1574 = vperm.xlu1 %2408, %v3002_v51   ;;  %1556 = vperm.xlu2 %2407, %v2977_v62  }
 0x5c2   : > { %v1641_v63 = vpop.permute.xlu0 %1640 }
 0x5c7   : > { %2411 = vset.pattern.permute.xlu1 %v3233_v40  ;;  %1568 = vperm.xlu2 %2407, %v2996_v26  }
 0x5c9   : > { %v1443_v31 = vpop.permute.xlu1 %1442  ;;  %v1467_v40 = vpop.permute.xlu2 %1466 }
 0x5cf   : > { %1592 = vperm.xlu1 %2411, %v3011_v22   ;;  %2410 = vset.pattern.permute.xlu2 %v3261_v28 }
 0x5d1   : > { %v1455_v32 = vpop.permute.xlu1 %1454  ;;  %v1479_v28 = vpop.permute.xlu2 %1478 }
 0x5d2   : > { %v1698_v57 = vsel %vm362_vm0, %v1359_v34, %v1455_v32  ;;  %v1702_v45 = vsel %vm362_vm0, %v3365_v50, %v1479_v28 }
 0x5d3   : > { %v3394_v5 = vsel %vm461_vm8, %v1698_v57, %v1551_v2 }
 0x5d7   : > { %2413 = vset.pattern.permute.xlu1 %v3310_v10  ;;  %1586 = vperm.xlu2 %2410, %v3011_v22  }
 0x5df   : > { %1604 = vperm.xlu1 %2413, %v2959_v52   ;;  %2412 = vset.pattern.permute.xlu2 %v3288_v61 }
 0x5e1   : > { %v1473_v7 = vpop.permute.xlu1 %1472  ;;  %v3408_v24 = vpop.permute.xlu2 %1496 }
 0x5e7   : > { %2416 = vset.pattern.permute.xlu1 %v3288_v61  ;;  %1598 = vperm.xlu2 %2412, %v2959_v52   ;;  %v1690_v52 = vsel %vm362_vm0, %v3318_v6, %v1407_v27  ;;  %v1671_v27 = vpop.permute.xlu0 %1670 }
 0x5e9   : > { %v1485_v30 = vpop.permute.xlu1 %1484 }
 0x5ea   : > { %v1703_v41 = vsel %vm362_vm0, %v1389_v38, %v1485_v30  ;;  %v1700_v38 = vsel %vm362_vm0, %v3332_v16, %v1467_v40 }
 0x5eb   : > { %v3404_v54 = vsel %vm461_vm8, %v1703_v41, %v1581_v42 }
 0x5ef   : > { %1622 = vperm.xlu1 %2416, %v2968_v58   ;;  %2415 = vset.pattern.permute.xlu2 %v3310_v10 }
 0x5f1   : > { %v1509_v3 = vpop.permute.xlu2 %1508 }
 0x5f7   : > { %1634 = vperm.xlu1 %2416, %v2971_v59   ;;  %1616 = vperm.xlu2 %2415, %v2962_v53  }
 0x5f9   : > { %v1503_v35 = vpop.permute.xlu1 %1502 }
 0x5fa   : > { %v1706_v39 = vsel %vm461_vm8, %v1690_v52, %v1503_v35 }
 0x5ff   : > { %2419 = vset.pattern.permute.xlu1 %v3310_v10  ;;  %1628 = vperm.xlu2 %2415, %v2968_v58   ;;  %v1696_v58 = vsel %vm362_vm0, %v3361_v55, %v1443_v31 }
 0x601   : > { %v1515_v11 = vpop.permute.xlu1 %1514  ;;  %v1527_v12 = vpop.permute.xlu2 %1526 }
 0x602   : > { %v1708_v59 = vsel %vm461_vm8, %v1692_v14, %v1515_v11  ;;  %v1710_v53 = vsel %vm461_vm8, %v3344_v23, %v1527_v12  ;;  %v1695_v23 = vsel %vm362_vm0, %v3325_v56, %v1437_v49 }
 0x603   : > { %v1724_v6 = vsel %vm1241_vm15, %v1708_v59, %v1611_v8 }
 0x604   : > { %1740 = vst [vmem:[#allocation5 + $0x48] sm:$0xff] %v1724_v6 }
 0x607   : > { %1652 = vperm.xlu1 %2419, %v2977_v62   ;;  %2418 = vset.pattern.permute.xlu2 %v3288_v61 }
 0x609   : > { %v1539_v37 = vpop.permute.xlu2 %1538 }
 0x60a   : > { %v1712_v17 = vsel %vm461_vm8, %v1696_v58, %v1539_v37 }
 0x60f   : > { %1664 = vperm.xlu1 %2419, %v2996_v26   ;;  %1646 = vperm.xlu2 %2418, %v2977_v62  }
 0x611   : > { %v1533_v48 = vpop.permute.xlu1 %1532 }
 0x612   : > { %v1711_v13 = vsel %vm461_vm8, %v1695_v23, %v1533_v48 }
 0x617   : > { %2422 = vset.pattern.permute.xlu1 %v3288_v61  ;;  %1658 = vperm.xlu2 %2418, %v2996_v26   ;;  %v1701_v26 = vsel %vm362_vm0, %v3374_v21, %v1473_v7 }
 0x619   : > { %v1545_v55 = vpop.permute.xlu1 %1544  ;;  %v1557_v34 = vpop.permute.xlu2 %1556 }
 0x61a   : > { %v1713_v9 = vsel %vm461_vm8, %v1697_v4, %v1545_v55  ;;  %v1715_v62 = vsel %vm461_vm8, %v3357_v60, %v1557_v34 }
 0x61b   : > { %v1729_v56 = vsel %vm1241_vm15, %v1713_v9, %v1641_v63 }
 0x61c   : > { %1745 = vst [vmem:[#allocation5 + $0x38] sm:$0xff] %v1729_v56 }
 0x61f   : > { %1682 = vperm.xlu1 %2422, %v3011_v22   ;;  %2421 = vset.pattern.permute.xlu2 %v3310_v10 }
 0x621   : > { %v1569_v61 = vpop.permute.xlu2 %1568 }
 0x622   : > { %v1717_v25 = vsel %vm461_vm8, %v1701_v26, %v1569_v61 }
 0x627   : > { %1676 = vperm.xlu2 %2421, %v3002_v51  }
 0x629   : > { %v1563_v43 = vpop.permute.xlu1 %1562 }
 0x62a   : > { %v1716_v60 = vsel %vm461_vm8, %v1700_v38, %v1563_v43 }
 0x62f   : > { %1688 = vperm.xlu2 %2421, %v3011_v22   ;;  %v1691_v22 = vsel %vm362_vm0, %v3352_v44, %v3378_v20 }
 0x630   : > { %v1707_v50 = vsel %vm461_vm8, %v1691_v22, %v1509_v3 }
 0x631   : > { %v1575_v10 = vpop.permute.xlu1 %1574  ;;  %v1587_v29 = vpop.permute.xlu2 %1586 }
 0x632   : > { %v1718_v21 = vsel %vm461_vm8, %v1702_v45, %v1575_v10  ;;  %v1720_v47 = vsel %vm461_vm8, %v3370_v19, %v1587_v29 }
 0x633   : > { %v1734_v51 = vsel %vm1241_vm15, %v1718_v21, %v1671_v27 }
 0x634   : > { %1750 = vst [vmem:[#allocation5 + $0x58] sm:$0xff] %v1734_v51 }
 0x641   : > { %v1599_v16 = vpop.permute.xlu2 %1598  ;;  %v1593_v49 = vpop.permute.xlu1 %1592 }
 0x642   : > { %v1722_v31 = vsel %vm1241_vm15, %v1706_v39, %v1599_v16 }
 0x643   : > { %1738 = vst [vmem:[#allocation5 + $0x8] sm:$0xff] %v1722_v31 }
 0x651   : > { %v1605_v32 = vpop.permute.xlu1 %1604  ;;  %v1617_v2 = vpop.permute.xlu2 %1616 }
 0x652   : > { %v1723_v57 = vsel %vm1241_vm15, %v1707_v50, %v1605_v32  ;;  %v1725_v19 = vsel %vm1241_vm15, %v3384_v36, %v1617_v2 }
 0x653   : > { %1739 = vst [vmem:[#allocation5] sm:$0xff] %v1723_v57 }
 0x654   : > { %1741 = vst [vmem:[#allocation5 + $0x60] sm:$0xff] %v1725_v19 }
 0x659   : > { %v1629_v33 = vpop.permute.xlu2 %1628 }
 0x65a   : > { %v1727_v40 = vsel %vm1241_vm15, %v1711_v13, %v1629_v33 }
 0x65b   : > { %1743 = vst [vmem:[#allocation5 + $0x18] sm:$0xff] %v1727_v40 }
 0x661   : > { %v1623_v7 = vpop.permute.xlu1 %1622 }
 0x662   : > { %v1726_v28 = vsel %vm1241_vm15, %v1710_v53, %v1623_v7 }
 0x663   : > { %1742 = vst [vmem:[#allocation5 + $0x68] sm:$0xff] %v1726_v28 }
 0x669   : > { %v1635_v44 = vpop.permute.xlu1 %1634  ;;  %v1647_v20 = vpop.permute.xlu2 %1646 }
 0x66a   : > { %v1728_v30 = vsel %vm1241_vm15, %v1712_v17, %v1635_v44  ;;  %v1730_v42 = vsel %vm1241_vm15, %v3394_v5, %v1647_v20  ;;  %v1705_v5 = vsel %vm362_vm0, %v3337_v15, %v3408_v24 }
 0x66b   : > { %1744 = vst [vmem:[#allocation5 + $0x10] sm:$0xff] %v1728_v30  ;;  %v1721_v12 = vsel %vm461_vm8, %v1705_v5, %v1593_v49 }
 0x66c   : > { %1746 = vst [vmem:[#allocation5 + $0x40] sm:$0xff] %v1730_v42 }
 0x671   : > { %v1659_v36 = vpop.permute.xlu2 %1658 }
 0x672   : > { %v1732_v41 = vsel %vm1241_vm15, %v1716_v60, %v1659_v36 }
 0x673   : > { %1748 = vst [vmem:[#allocation5 + $0x70] sm:$0xff] %v1732_v41 }
 0x679   : > { %v1653_v52 = vpop.permute.xlu1 %1652 }
 0x67a   : > { %v1731_v3 = vsel %vm1241_vm15, %v1715_v62, %v1653_v52 }
 0x67b   : > { %1747 = vst [vmem:[#allocation5 + $0x28] sm:$0xff] %v1731_v3 }
 0x681   : > { %v1665_v35 = vpop.permute.xlu1 %1664  ;;  %v1677_v39 = vpop.permute.xlu2 %1676 }
 0x682   : > { %v1733_v14 = vsel %vm1241_vm15, %v1717_v25, %v1665_v35  ;;  %v1735_v11 = vsel %vm1241_vm15, %v3404_v54, %v1677_v39 }
 0x683   : > { %1749 = vst [vmem:[#allocation5 + $0x20] sm:$0xff] %v1733_v14 }
 0x684   : > { %1751 = vst [vmem:[#allocation5 + $0x30] sm:$0xff] %v1735_v11 }
 0x689   : > { %v1689_v8 = vpop.permute.xlu2 %1688 }
 0x68a   : > { %v1737_v59 = vsel %vm1241_vm15, %v1721_v12, %v1689_v8 }
 0x68b   : > { %1753 = vst [vmem:[#allocation5 + $0x78] sm:$0xff] %v1737_v59 }
 0x68f   : > { %1757 = sbr.rel (%p3539_p1) target bundleno = 1687 (0x697), region = 72 }
 0x691   : > { %v1683_v53 = vpop.permute.xlu1 %1682 }
 0x692   : > { %v1736_v6 = vsel %vm1241_vm15, %v1720_v47, %v1683_v53 }
 0x693   : > { %1752 = vst [vmem:[#allocation5 + $0x50] sm:$0xff] %v1736_v6 }
 0x694   : > { %v2750_v54 = vmov 0.0  }
 0x695   : > { %1758 = vst [vmem:[#allocation2] sm:$0xff] %v2750_v54 }
 0x696   : > { %1759 = vst [vmem:[#allocation2 + $0x8] sm:$0xff] %v2750_v54 }
 0x697 PF: > { %v1762_v58 = vld [vmem:[#allocation3 + $0x28] sm:$0xff]  ;;  %v1763_v37 = vld [vmem:[#allocation3 + $0x50] sm:$0xff]  ;;  %v1766_v23 = vld [vmem:[#allocation4] sm:$0xff]  ;;  %s2751_s12 = smov 64   ;;  %s2207_s14 = sshll.u32 %s2811_s28, 3 }
 0x698   : > { %v1767_v48 = vld [vmem:[#allocation4 + $0x30] sm:$0xff]  ;;  %v1770_v4 = vld [vmem:[#allocation5 + $0x8] sm:$0xff]  ;;  %v1771_v63 = vld [vmem:[#allocation5] sm:$0xff]  ;;  %s1966_s26 = scalar_lea.hbm %s3532_s6, %s2207_s14  ;;  %s1968_s8 = sshll.u32 %s3483_s11, 4  ;;  %s1969_s8 = int_to_ptr.vmem [resolvable:$true] %s1968_s8 }
 0x699   : > { %v1783_v55 = vld [vmem:[#allocation3 + $0x10] sm:$0xff]  ;;  %v1784_v9 = vld [vmem:[#allocation3 + $0x48] sm:$0xff]  ;;  %v1788_v56 = vld [vmem:[#allocation4 + $0x38] sm:$0xff]  ;;  %s1970_s27 = sshll.u32 %s1966_s26, 4  ;;  %s1956_s9 = scalar_lea.sflag [#allocation9], %s2905_s25  ;;  %s1971_s27 = int_to_ptr.hbm [resolvable:$true] %s1970_s27 }
 0x69a   : > { %v1789_v25 = vld [vmem:[#allocation4 + $0x20] sm:$0xff]  ;;  %v1793_v60 = vld [vmem:[#allocation5 + $0x48] sm:$0xff]  ;;  %v1817_v33 = vld [vmem:[#allocation5 + $0x18] sm:$0xff]  ;;  %s2673_s10 = sshra.s32 %s1971_s27, 4  ;;  %s2679_s20 = scalar_lea.hbm %s3532_s6, 16  ;;  %s2674_s10 = int_to_ptr.hbm [resolvable:$true] %s2673_s10 }
 0x69b   : > { %v1806_v45 = vld [vmem:[#allocation3 + $0x60] sm:$0xff]  ;;  %v1812_v49 = vld [vmem:[#allocation4 + $0x28] sm:$0xff]  ;;  %v1830_v40 = vld [vmem:[#allocation3 + $0x78] sm:$0xff]  ;;  %s2675_s28 = scalar_lea.hbm %s2674_s10, 8  ;;  %p2680_p9 = scmp.lt.s32.totalorder %s2674_s10, %s3532_s6 }
 0x69c   : > { %v1760_v15 = vld [vmem:[#allocation2] sm:$0xff]  ;;  %v1794_v29 = vld [vmem:[#allocation5 + $0x60] sm:$0xff]  ;;  %v1816_v2 = vld [vmem:[#allocation5 + $0x68] sm:$0xff]  ;;  %p2676_p3 = scmp.ne.s32.totalorder %s2674_s10, %s2675_s28  ;;  %p2681_p8 = scmp.lt.s32.totalorder %s2679_s20, %s2675_s28 }
 0x69d   : > { %v1761_v24 = vld [vmem:[#allocation2 + $0x8] sm:$0xff]  ;;  %v1764_v17 = vmul.f32 %v1762_v58, %v1760_v15  ;;  %v1807_v27 = vld [vmem:[#allocation3] sm:$0xff]  ;;  %v1834_v20 = vld [vmem:[#allocation4 + $0x10] sm:$0xff] }
 0x69e   : > { %v1765_v13 = vmul.f32 %v1763_v37, %v1761_v24  ;;  %v1811_v51 = vld [vmem:[#allocation4 + $0x60] sm:$0xff]  ;;  %v1835_v36 = vld [vmem:[#allocation4 + $0x68] sm:$0xff]  ;;  %v1839_v39 = vld [vmem:[#allocation5 + $0x10] sm:$0xff]  ;;  %p2677_p4 = pnand %p2676_p3, %p2874_p0  ;;  %p2682_p10 = por %p2681_p8, %p2680_p9 }
 0x69f   : > { %v1768_v34 = vadd.f32 %v1766_v23, %v1764_v17  ;;  %v1829_v57 = vld [vmem:[#allocation3 + $0x40] sm:$0xff]  ;;  %v1852_v14 = vld [vmem:[#allocation3 + $0x18] sm:$0xff]  ;;  %v1853_v6 = vld [vmem:[#allocation3 + $0x8] sm:$0xff] }
 0x6a0   : > { %v1769_v62 = vadd.f32 %v1767_v48, %v1765_v13  ;;  %v1840_v5 = vld [vmem:[#allocation5 + $0x38] sm:$0xff]  ;;  %v1857_v54 = vld [vmem:[#allocation4 + $0x8] sm:$0xff]  ;;  %v1862_v13 = vld [vmem:[#allocation5 + $0x40] sm:$0xff]  ;;  %p2678_p13 = pneg %p2677_p4 }
 0x6a1   : > { %v1772_v26 = vmul.f32 %v1770_v4, %v1768_v34  ;;  %v1785_v61 = vmul.f32 %v1783_v55, %v1768_v34  ;;  %v1858_v48 = vld [vmem:[#allocation4 + $0x78] sm:$0xff]  ;;  %v1875_v4 = vld [vmem:[#allocation3 + $0x30] sm:$0xff] }
 0x6a2   : > { %v1773_v38 = vmul.f32 %v1771_v63, %v1769_v62  ;;  %v1786_v43 = vmul.f32 %v1784_v9, %v1769_v62  ;;  %p2683_p11 = pnand %p2682_p10, %p2678_p13 }
 0x6a3   : > { %v1790_v10 = vadd.f32 %v1788_v56, %v1785_v61  ;;  %v1876_v61 = vld [vmem:[#allocation3 + $0x58] sm:$0xff] }
 0x6a4   : > { %v1774_v21 = vadd.f32 %v1773_v38, %v1772_v26  ;;  %v1791_v47 = vadd.f32 %v1789_v25, %v1786_v43  ;;  %v1863_v26 = vld [vmem:[#allocation5 + $0x28] sm:$0xff]  ;;  %v1880_v25 = vld [vmem:[#allocation4 + $0x50] sm:$0xff] }
 0x6a5   : > { %v1795_v16 = vmul.f32 %v1793_v60, %v1790_v10  ;;  %v1808_v31 = vmul.f32 %v1806_v45, %v1790_v10  ;;  %v1881_v45 = vld [vmem:[#allocation4 + $0x40] sm:$0xff]  ;;  %v1885_v10 = vld [vmem:[#allocation5 + $0x70] sm:$0xff] }
 0x6a6   : > { %v1775_v22 = vrot.slane %v1774_v21, 4  ;;  %v1796_v50 = vmul.f32 %v1794_v29, %v1791_v47  ;;  %v1809_v32 = vmul.f32 %v1807_v27, %v1791_v47  ;;  %v1898_v47 = vld [vmem:[#allocation3 + $0x68] sm:$0xff] }
 0x6a7   : > { %v1813_v19 = vadd.f32 %v1811_v51, %v1808_v31 }
 0x6a8   : > { %v1776_v7 = vadd.f32 %v1775_v22, %v1774_v21  ;;  %v1797_v28 = vadd.f32 %v1796_v50, %v1795_v16  ;;  %v1814_v44 = vadd.f32 %v1812_v49, %v1809_v32  ;;  %v1886_v32 = vld [vmem:[#allocation5 + $0x20] sm:$0xff] }
 0x6a9   : > { %v1818_v30 = vmul.f32 %v1816_v2, %v1813_v19  ;;  %v1831_v42 = vmul.f32 %v1829_v57, %v1813_v19  ;;  %v1899_v2 = vld [vmem:[#allocation3 + $0x70] sm:$0xff]  ;;  %v1903_v57 = vld [vmem:[#allocation4 + $0x48] sm:$0xff] }
 0x6aa   : > { %v1777_v41 = vrot.slane %v1776_v7, 2  ;;  %v1798_v52 = vrot.slane %v1797_v28, 4  ;;  %v1819_v3 = vmul.f32 %v1817_v33, %v1814_v44  ;;  %v1832_v35 = vmul.f32 %v1830_v40, %v1814_v44 }
 0x6ab   : > { %v1836_v11 = vadd.f32 %v1834_v20, %v1831_v42  ;;  %v1904_v20 = vld [vmem:[#allocation4 + $0x58] sm:$0xff] }
 0x6ac   : > { %v1778_v12 = vadd.f32 %v1777_v41, %v1776_v7  ;;  %v1799_v8 = vadd.f32 %v1798_v52, %v1797_v28  ;;  %v1820_v59 = vadd.f32 %v1819_v3, %v1818_v30  ;;  %v1837_v53 = vadd.f32 %v1835_v36, %v1832_v35  ;;  %v1908_v30 = vld [vmem:[#allocation5 + $0x58] sm:$0xff]  ;;  %v1921_v3 = vld [vmem:[#allocation3 + $0x20] sm:$0xff] }
 0x6ad   : > { %v1841_v15 = vmul.f32 %v1839_v39, %v1836_v11  ;;  %v1854_v24 = vmul.f32 %v1852_v14, %v1836_v11  ;;  %v1909_v14 = vld [vmem:[#allocation5 + $0x30] sm:$0xff]  ;;  %v1922_v11 = vld [vmem:[#allocation3 + $0x38] sm:$0xff] }
 0x6ae   : > { %v1779_v58 = vrot.slane %v1778_v12, 1  ;;  %v1800_v37 = vrot.slane %v1799_v8, 2  ;;  %v1821_v17 = vrot.slane %v1820_v59, 4  ;;  %v1842_v23 = vmul.f32 %v1840_v5, %v1837_v53 }
 0x6af   : > { %v1855_v55 = vmul.f32 %v1853_v6, %v1837_v53  ;;  %v1859_v34 = vadd.f32 %v1857_v54, %v1854_v24  ;;  %v1926_v53 = vld [vmem:[#allocation4 + $0x70] sm:$0xff] }
 0x6b0   : > { %v1780_v63 = vadd.f32 %v1779_v58, %v1778_v12  ;;  %v1801_v9 = vadd.f32 %v1800_v37, %v1799_v8  ;;  %v1822_v62 = vadd.f32 %v1821_v17, %v1820_v59  ;;  %v1843_v56 = vadd.f32 %v1842_v23, %v1841_v15  ;;  %v1927_v15 = vld [vmem:[#allocation4 + $0x18] sm:$0xff]  ;;  %v1931_v23 = vld [vmem:[#allocation5 + $0x50] sm:$0xff] }
 0x6b1   : > { %v1860_v38 = vadd.f32 %v1858_v48, %v1855_v55  ;;  %v1864_v43 = vmul.f32 %v1862_v13, %v1859_v34  ;;  %v1877_v60 = vmul.f32 %v1875_v4, %v1859_v34  ;;  %v1932_v4 = vld [vmem:[#allocation5 + $0x78] sm:$0xff] }
 0x6b2   : > { %1781 = vst [vmem:[#allocation6] sm:$0x1] %v1780_v63  ;;  %v1802_v29 = vrot.slane %v1801_v9, 1  ;;  %v1823_v27 = vrot.slane %v1822_v62, 2  ;;  %v1844_v21 = vrot.slane %v1843_v56, 4 }
 0x6b3   : > { %v1865_v51 = vmul.f32 %v1863_v26, %v1860_v38  ;;  %v1878_v16 = vmul.f32 %v1876_v61, %v1860_v38  ;;  %v1882_v31 = vadd.f32 %v1880_v25, %v1877_v60 }
 0x6b4   : > { %v1803_v49 = vadd.f32 %v1802_v29, %v1801_v9  ;;  %v1824_v22 = vadd.f32 %v1823_v27, %v1822_v62  ;;  %v1845_v50 = vadd.f32 %v1844_v21, %v1843_v56 }
 0x6b5   : > { %v1866_v19 = vadd.f32 %v1865_v51, %v1864_v43  ;;  %v1883_v33 = vadd.f32 %v1881_v45, %v1878_v16  ;;  %v1887_v40 = vmul.f32 %v1885_v10, %v1882_v31  ;;  %v1900_v7 = vmul.f32 %v1898_v47, %v1882_v31 }
 0x6b6   : > { %1804 = vst [vmem:[#allocation6 + $0x1] sm:$0x1] %v1803_v49  ;;  %v1825_v28 = vrot.slane %v1824_v22, 1  ;;  %v1846_v44 = vrot.slane %v1845_v50, 2 }
 0x6b7   : > { %v1867_v42 = vrot.slane %v1866_v19, 4  ;;  %v1888_v36 = vmul.f32 %v1886_v32, %v1883_v33  ;;  %v1901_v41 = vmul.f32 %v1899_v2, %v1883_v33  ;;  %v1905_v52 = vadd.f32 %v1903_v57, %v1900_v7 }
 0x6b8   : > { %v1826_v35 = vadd.f32 %v1825_v28, %v1824_v22  ;;  %v1847_v39 = vadd.f32 %v1846_v44, %v1845_v50  ;;  %v1946_v2 = vperm.slane %v2927_v0, 0 }
 0x6b9   : > { %v1868_v5 = vadd.f32 %v1867_v42, %v1866_v19  ;;  %v1889_v12 = vadd.f32 %v1888_v36, %v1887_v40  ;;  %v1906_v8 = vadd.f32 %v1904_v20, %v1901_v41  ;;  %v1910_v59 = vmul.f32 %v1908_v30, %v1905_v52 }
 0x6ba   : > { %1827 = vst [vmem:[#allocation6 + $0x2] sm:$0x1] %v1826_v35  ;;  %v1848_v6 = vrot.slane %v1847_v39, 1  ;;  %v1923_v54 = vmul.f32 %v1921_v3, %v1905_v52  ;;  %v1947_v57 = vmul.f32 %v1946_v2, %v2952_v46 }
 0x6bb   : > { %v1869_v24 = vrot.slane %v1868_v5, 2  ;;  %v1890_v58 = vrot.slane %v1889_v12, 4  ;;  %v1911_v37 = vmul.f32 %v1909_v14, %v1906_v8  ;;  %v1924_v17 = vmul.f32 %v1922_v11, %v1906_v8 }
 0x6bc   : > { %v1849_v48 = vadd.f32 %v1848_v6, %v1847_v39  ;;  %v1928_v13 = vadd.f32 %v1926_v53, %v1923_v54 }
 0x6bd   : > { %v1870_v55 = vadd.f32 %v1869_v24, %v1868_v5  ;;  %v1891_v34 = vadd.f32 %v1890_v58, %v1889_v12  ;;  %v1912_v63 = vadd.f32 %v1911_v37, %v1910_v59  ;;  %v1929_v9 = vadd.f32 %v1927_v15, %v1924_v17 }
 0x6be   : > { %1850 = vst [vmem:[#allocation6 + $0x3] sm:$0x1] %v1849_v48  ;;  %v1933_v62 = vmul.f32 %v1931_v23, %v1928_v13 }
 0x6bf   : > { %v1871_v56 = vrot.slane %v1870_v55, 1  ;;  %v1892_v26 = vrot.slane %v1891_v34, 2  ;;  %v1913_v61 = vrot.slane %v1912_v63, 4  ;;  %v1934_v25 = vmul.f32 %v1932_v4, %v1929_v9  ;;  %1943 = vst [vmem:[#allocation2] sm:$0xff] %v1928_v13 }
 0x6c0   : > { %1944 = vst [vmem:[#allocation2 + $0x8] sm:$0xff] %v1929_v9 }
 0x6c1   : > { %v1872_v38 = vadd.f32 %v1871_v56, %v1870_v55  ;;  %v1893_v43 = vadd.f32 %v1892_v26, %v1891_v34  ;;  %v1914_v60 = vadd.f32 %v1913_v61, %v1912_v63  ;;  %v1935_v45 = vadd.f32 %v1934_v25, %v1933_v62 }
 0x6c3   : > { %1873 = vst [vmem:[#allocation6 + $0x4] sm:$0x1] %v1872_v38  ;;  %v1894_v10 = vrot.slane %v1893_v43, 1  ;;  %v1915_v29 = vrot.slane %v1914_v60, 2  ;;  %v1936_v27 = vrot.slane %v1935_v45, 4 }
 0x6c5   : > { %v1895_v21 = vadd.f32 %v1894_v10, %v1893_v43  ;;  %v1916_v47 = vadd.f32 %v1915_v29, %v1914_v60  ;;  %v1937_v51 = vadd.f32 %v1936_v27, %v1935_v45 }
 0x6c7   : > { %1896 = vst [vmem:[#allocation6 + $0x5] sm:$0x1] %v1895_v21  ;;  %v1917_v16 = vrot.slane %v1916_v47, 1  ;;  %v1938_v31 = vrot.slane %v1937_v51, 2 }
 0x6c9   : > { %v1918_v49 = vadd.f32 %v1917_v16, %v1916_v47  ;;  %v1939_v22 = vadd.f32 %v1938_v31, %v1937_v51 }
 0x6cb   : > { %1919 = vst [vmem:[#allocation6 + $0x6] sm:$0x1] %v1918_v49  ;;  %v1940_v50 = vrot.slane %v1939_v22, 1 }
 0x6cd   : > { %v1941_v32 = vadd.f32 %v1940_v50, %v1939_v22 }
 0x6cf   : > { %1942 = vst [vmem:[#allocation6 + $0x7] sm:$0x1] %v1941_v32 }
 0x6d6   : > { %v1945_v19 = vld [vmem:[#allocation6] sm:$0xff] }
 0x6d7   : > { %v1948_v33 = vadd.f32 %v1947_v57, %v1945_v19 }
 0x6d9   : > { %1949 = vrot.lane.b32.xlu0 %v1948_v33, %s2751_s12 }
 0x74b   : > { %v1950_v40 = vpop.permute.xlu0 %1949 }
 0x74c   : > { %v1951_v7 = vadd.f32 %v1950_v40, %v1948_v33 }
 0x74e   : > { %v1952_v0 = vmul.f32 %v1951_v7, %v2942_v18 }
 0x750   : > { %v1953_v28 = vadd.f32 %v1952_v0, %v2929_v1 }
 0x752   : > { %1954 = vst [vmem:[%s3483_s11] sm:$0xff] %v1953_v28 }
 0x753   : > { %2686 = shalt.err (!%p2683_p11)
}
 0x754   : > { %2256 = dma.vmem_to_hbm [thread:$0]  (%p2874_p0), %s1969_s8, 128, %s1971_s27, %s1956_s9  }
 0x755 PF: > { %s1982_s25 = sand.u32 1, %s2725_s21   ;;  %p3540_p12 = scmp.ge.s32.totalorder %s2737_s24, 2 }
 0x756   : > { %s1983_s11 = scalar_lea.sflag [#allocation9], %s1982_s25 }
 0x757   : > { %p2279_p6 = pnand %p3540_p12, %p2879_p7 }
 0x759   : > { %p2280_p2 = pneg %p2279_p6 }
 0x75b   : > { %2720 = dma.done.wait (%p2280_p2), %s1983_s11, 128  }
 0x75c   : > { %2722 = vsyncadd (%p2280_p2), %s1983_s11, 4294967168  ;;  %p22_p5 = scmp.ge.s32.totalorder %s2854_s19, 4   ;;  %s3541_s21 = smov %s2729_s22 }
 0x75d   : > { %s3542_s22 = smov %s2733_s23  ;;  %s3543_s23 = smov %s2866_s17 }
 0x75e   : > { %s3544_s24 = smov %s2854_s19  ;;  %24 = sbr.rel (!%p22_p5) target bundleno = 8 (0x8), region = 134 }
 0x763   :  { %1989 = vsyncpa [#allocation8], 1 }
 0x764   :  { %1991 = vsyncpa [#allocation8 + $0x1], 1 }
 0x765   :  { %1992 = vsyncpa [#allocation11], 1 }
 0x766   :  { %1993 = vsyncpa [#allocation14], 1 }
 0x767   :  { %1994 = vsyncpa [#allocation17], 1 }
 0x768   :  { %1995 = vsyncpa [#allocation9], 1 }
 0x769   :  { %1997 = vsyncpa [#allocation9 + $0x1], 1 }

</bundles_post_ra>
